<compile_context>
chip_gen: v7x
topology: tpu7x:2x2x1
jax: 0.10.0
libtpu: 0.0.40
codegen_flags: <defaults>
</compile_context>

<pallas_src>
import jax
import jax.numpy as jnp
from jax.experimental import pallas as pl
from jax.experimental.pallas import tpu as pltpu

NUM_EXPERTS = 3   # mean, weighted-mean, max-pooling
TOP_K = 2         # configs.num_used_experts


def data_prep_kernel(x_a_ref, x_b_ref, adjs_ref, bin_ref, hnb_ref,
                     w1_ref, b1_ref, w2_ref, b2_ref, wcat_ref, bstack_ref,
                     out_ref):
    f32 = jnp.float32
    x_a = x_a_ref[...]                       # (B*N, T)  rows = b*N + n, T on lanes
    x_b = x_b_ref[...]                       # (N, B*T)  cols = b*T + t (lane dense)
    BN, T = x_a.shape
    N, BT = x_b.shape
    B = BN // N
    E = NUM_EXPERTS

    # ---- SparseGatingNetwork, batched over all (b, n) rows --------------------
    h = jnp.maximum(
        jnp.dot(x_a, w1_ref[...], preferred_element_type=f32) + b1_ref[...], 0.0)
    logits = jnp.dot(h, w2_ref[...], preferred_element_type=f32) + b2_ref[...]   # (BN, E)

    # top-2 of 3 == exclude the argmin (tie-break: exclude the highest index,
    # which keeps the lower-indexed maxima selected, same as before).
    lane = jax.lax.broadcasted_iota(jnp.int32, (BN, E), 1)
    is_min = logits == jnp.min(logits, axis=-1, keepdims=True)
    excl = jnp.max(jnp.where(is_min, lane, -1), axis=-1, keepdims=True)
    sel = lane != excl                                                          # exactly K=2 True
    masked = jnp.where(sel, logits, -jnp.inf)
    mx = jnp.max(masked, axis=-1, keepdims=True)
    ex = jnp.where(sel, jnp.exp(masked - mx), 0.0)
    gate_w = ex / jnp.sum(ex, axis=-1, keepdims=True)                           # (BN, E)

    # ---- mean + weighted-mean aggregation: ONE stacked, batched matmul --------
    # adjs_ref = [bin_adj/deg ; adj_ns/wsum] precomputed in the wrapper.
    agg = jnp.dot(adjs_ref[...], x_b, preferred_element_type=f32)               # (2N, BT)
    mean_b = agg[:N, :]
    wmean_b = agg[N:, :]

    # ---- max-pooling aggregation: running max over source nodes ---------------
    # (no (N, N, T) intermediate; elementwise maximum on the VPU)
    bin_adj = bin_ref[...]                                                      # (N, N)
    neg = jnp.float32(-3.0e38)
    nmax = jnp.full((N, BT), neg, dtype=f32)
    for j in range(N):   # N is static/small here; use lax.fori_loop over source chunks for large N
        nmax = jnp.maximum(
            nmax, jnp.where(bin_adj[:, j:j + 1] > 0.0, x_b[j:j + 1, :], neg))
    nmax = jnp.where(hnb_ref[...] > 0.0, nmax, 0.0)                             # isolated nodes -> 0

    # ---- relayout (N, B*T) -> (B*N, T) via static per-batch lane slices -------
    def to_a(y):                              # y: (N, B*T) -> (B*N, T), row = b*N + n
        return jnp.concatenate([y[:, b * T:(b + 1) * T] for b in range(B)], axis=0)

    mean_a, wmean_a, max_a = to_a(mean_b), to_a(wmean_b), to_a(nmax)

    # ---- fused expert Linears + sparse-gate combine ----------------------------
    # sum_e g_e * (agg_e @ W_e + b_e) == concat_e(g_e * agg_e) @ vstack(W_e) + sum_e g_e * b_e
    g0 = gate_w[:, 0:1]
    g1 = gate_w[:, 1:2]
    g2 = gate_w[:, 2:3]
    g_cat = jnp.concatenate([g0 * mean_a, g1 * wmean_a, g2 * max_a], axis=-1)   # (BN, 3T)
    bias = (g0 * bstack_ref[0:1, :] + g1 * bstack_ref[1:2, :] + g2 * bstack_ref[2:3, :])
    combined = jnp.dot(g_cat, wcat_ref[...], preferred_element_type=f32) + bias  # (BN, T)

    # ---- fill missing entries only; store in lane-dense (N, B*T) layout -------
    def to_b(y):                              # y: (B*N, T) -> (N, B*T)
        return jnp.concatenate([y[b * N:(b + 1) * N, :] for b in range(B)], axis=1)

    comb_b = to_b(combined)                                                     # (N, BT)
    miss = (x_b == 0.0).astype(f32)
    out_ref[...] = x_b * (1.0 - miss) + comb_b * miss


def data_preparation(adj, x_enc, params):
    """adj: [N, N]; x_enc: [B, T, N, 1] -> returns [B, T, N, 1]."""
    B, T, N, _ = x_enc.shape
    x = jnp.squeeze(x_enc, -1).astype(jnp.float32)                  # (B, T, N)

    # batch_unknown_nodes -> known-node mask (nodes whose sum over (b, t) is nonzero)
    known = (jnp.sum(x, axis=(0, 1)) != 0).astype(jnp.float32).reshape(1, N)

    # two working layouts of x (XLA does these transposes once, outside the kernel)
    x_a = jnp.transpose(x, (0, 2, 1)).reshape(B * N, T)             # (B*N, T)
    x_b = jnp.transpose(x, (2, 0, 1)).reshape(N, B * T)             # (N, B*T)

    # ---- adjacency prep hoisted out of the kernel (depends only on adj/known) --
    adj = adj.astype(jnp.float32)
    eye = jnp.eye(N, dtype=jnp.float32)
    adj_ns = jnp.where(eye > 0, 0.0, adj) * known                   # no self loops, drop unknown sources
    bin_adj = (adj_ns > 0).astype(jnp.float32)
    deg = jnp.sum(bin_adj, axis=-1, keepdims=True)
    wsum = jnp.sum(adj_ns, axis=-1, keepdims=True)
    adj_stack = jnp.concatenate([bin_adj / jnp.maximum(deg, 1.0),
                                 adj_ns / jnp.maximum(wsum, 1e-6)], axis=0)   # (2N, N)
    has_nb = (deg > 0).astype(jnp.float32)                          # (N, 1)

    w1, b1, w2, b2, wm, bm, ww, bw, wx, bx = params
    wcat = jnp.concatenate([wm, ww, wx], axis=0)                    # (3T, T)
    bstack = jnp.concatenate([bm, bw, bx], axis=0)                  # (3, T)

    def full(shape):
        return pl.BlockSpec(shape, lambda i, _n=len(shape): (0,) * _n)

    grid_spec = pltpu.PrefetchScalarGridSpec(
        num_scalar_prefetch=0,
        grid=(1,),
        in_specs=[
            full(x_a.shape), full(x_b.shape),
            full(adj_stack.shape), full(bin_adj.shape), full(has_nb.shape),
            full(w1.shape), full(b1.shape), full(w2.shape), full(b2.shape),
            full(wcat.shape), full(bstack.shape),
        ],
        out_specs=full((N, B * T)),
    )

    out_nbt = pl.pallas_call(
        data_prep_kernel,
        out_shape=jax.ShapeDtypeStruct((N, B * T), jnp.float32),
        grid_spec=grid_spec,
        compiler_params=pltpu.CompilerParams(
            dimension_semantics=("arbitrary",),
            vmem_limit_bytes=32 * 1024 * 1024),
    )(x_a, x_b, adj_stack, bin_adj, has_nb, w1, b1, w2, b2, wcat, bstack)

    # (N, B*T) -> (B, T, N, 1)
    out_btn = jnp.transpose(out_nbt.reshape(N, B, T), (1, 2, 0))
    return out_btn[..., None]


if __name__ == "__main__":
    B, T, N = 2, 8, 16          # batch, input_len, num_nodes
    D_MODEL = 32

    key = jax.random.PRNGKey(0)
    k_x, k_adj, k_drop, k_p = jax.random.split(key, 4)

    # inputs: positive values, with two fully-unknown sensor nodes and random point-missing
    x = jax.random.uniform(k_x, (B, T, N), jnp.float32, 0.5, 2.0)
    x = x.at[:, :, jnp.array([3, 7])].set(0.0)                # unknown nodes
    drop = jax.random.bernoulli(k_drop, 0.1, (B, T, N))
    x = jnp.where(drop, 0.0, x)
    x_enc = x[..., None]                                      # [B, T, N, 1]

    adj = jax.random.uniform(k_adj, (N, N), jnp.float32)
    adj = jnp.where(adj > 0.5, adj, 0.0)
    adj = (adj + adj.T) * 0.5
    adj = adj + jnp.eye(N, dtype=jnp.float32)                 # self loops (removed in prep)

    # deterministic parameter init (shapes implied by the module's __init__)
    pk = jax.random.split(k_p, 10)
    s = 0.1
    params = (
        s * jax.random.normal(pk[0], (T, D_MODEL), jnp.float32),            # gating fc1 W
        s * jax.random.normal(pk[1], (1, D_MODEL), jnp.float32),            # gating fc1 b
        s * jax.random.normal(pk[2], (D_MODEL, NUM_EXPERTS), jnp.float32),  # gating fc2 W
        s * jax.random.normal(pk[3], (1, NUM_EXPERTS), jnp.float32),        # gating fc2 b
        s * jax.random.normal(pk[4], (T, T), jnp.float32),                  # mean expert W
        s * jax.random.normal(pk[5], (1, T), jnp.float32),                  # mean expert b
        s * jax.random.normal(pk[6], (T, T), jnp.float32),                  # wmean expert W
        s * jax.random.normal(pk[7], (1, T), jnp.float32),                  # wmean expert b
        s * jax.random.normal(pk[8], (T, T), jnp.float32),                  # max expert W
        s * jax.random.normal(pk[9], (1, T), jnp.float32),                  # max expert b
    )

    out = data_preparation(adj, x_enc, params)
    jax.block_until_ready(out)
    assert out.shape == (B, T, N, 1) and out.dtype == jnp.float32
    print("KERNEL_OK")
</pallas_src>

<mosaic_0001>
module attributes {stable_mosaic.version = 11 : i64} {
  func.func @data_prep_kernel(%arg0: i32, %arg1: memref<32x8xf32, #tpu.memory_space<vmem>>, %arg2: memref<16x16xf32, #tpu.memory_space<vmem>>, %arg3: memref<32x16xf32, #tpu.memory_space<vmem>>, %arg4: memref<16x16xf32, #tpu.memory_space<vmem>>, %arg5: memref<16x1xf32, #tpu.memory_space<vmem>>, %arg6: memref<8x32xf32, #tpu.memory_space<vmem>>, %arg7: memref<1x32xf32, #tpu.memory_space<vmem>>, %arg8: memref<32x3xf32, #tpu.memory_space<vmem>>, %arg9: memref<1x3xf32, #tpu.memory_space<vmem>>, %arg10: memref<24x8xf32, #tpu.memory_space<vmem>>, %arg11: memref<3x8xf32, #tpu.memory_space<vmem>>, %arg12: memref<16x16xf32, #tpu.memory_space<vmem>>) attributes {dimension_semantics = [#tpu.dimension_semantics<arbitrary>], iteration_bounds = array<i64: 1>, scalar_prefetch = 0 : i64, scratch_operands = 0 : i64, tpu.core_type = #tpu.core_type<tc>, window_params = [{pipeline_mode = #tpu.pipeline_mode<synchronous>, transform_indices = @transform_0, window_bounds = array<i64: 32, 8>}, {pipeline_mode = #tpu.pipeline_mode<synchronous>, transform_indices = @transform_1, window_bounds = array<i64: 16, 16>}, {pipeline_mode = #tpu.pipeline_mode<synchronous>, transform_indices = @transform_2, window_bounds = array<i64: 32, 16>}, {pipeline_mode = #tpu.pipeline_mode<synchronous>, transform_indices = @transform_3, window_bounds = array<i64: 16, 16>}, {pipeline_mode = #tpu.pipeline_mode<synchronous>, transform_indices = @transform_4, window_bounds = array<i64: 16, 1>}, {pipeline_mode = #tpu.pipeline_mode<synchronous>, transform_indices = @transform_5, window_bounds = array<i64: 8, 32>}, {pipeline_mode = #tpu.pipeline_mode<synchronous>, transform_indices = @transform_6, window_bounds = array<i64: 1, 32>}, {pipeline_mode = #tpu.pipeline_mode<synchronous>, transform_indices = @transform_7, window_bounds = array<i64: 32, 3>}, {pipeline_mode = #tpu.pipeline_mode<synchronous>, transform_indices = @transform_8, window_bounds = array<i64: 1, 3>}, {pipeline_mode = #tpu.pipeline_mode<synchronous>, transform_indices = @transform_9, window_bounds = array<i64: 24, 8>}, {pipeline_mode = #tpu.pipeline_mode<synchronous>, transform_indices = @transform_10, window_bounds = array<i64: 3, 8>}, {pipeline_mode = #tpu.pipeline_mode<synchronous>, transform_indices = @transform_11, window_bounds = array<i64: 16, 16>}]} {
    %c0 = arith.constant 0 : index
    %c0_0 = arith.constant 0 : index
    %0 = vector.load %arg1[%c0, %c0_0] : memref<32x8xf32, #tpu.memory_space<vmem>>, vector<32x8xf32>
    %c0_1 = arith.constant 0 : index
    %c0_2 = arith.constant 0 : index
    %1 = vector.load %arg2[%c0_1, %c0_2] : memref<16x16xf32, #tpu.memory_space<vmem>>, vector<16x16xf32>
    %c0_3 = arith.constant 0 : index
    %c0_4 = arith.constant 0 : index
    %2 = vector.load %arg6[%c0_3, %c0_4] : memref<8x32xf32, #tpu.memory_space<vmem>>, vector<8x32xf32>
    %cst = arith.constant dense<0.000000e+00> : vector<32x32xf32>
    %3 = tpu.matmul %0, %2, %cst {dimension_numbers = #tpu.dot_dimension_numbers<[1], [0], [0], [1], [0, 0, 1, 1], [], []>} : vector<32x8xf32>, vector<8x32xf32>, vector<32x32xf32> -> vector<32x32xf32>
    %c0_5 = arith.constant 0 : index
    %c0_6 = arith.constant 0 : index
    %4 = vector.load %arg7[%c0_5, %c0_6] : memref<1x32xf32, #tpu.memory_space<vmem>>, vector<1x32xf32>
    %5 = vector.broadcast %4 : vector<1x32xf32> to vector<32x32xf32>
    %6 = arith.addf %3, %5 : vector<32x32xf32>
    %cst_7 = arith.constant 0.000000e+00 : f32
    %7 = vector.broadcast %cst_7 : f32 to vector<32x32xf32>
    %8 = arith.maximumf %6, %7 : vector<32x32xf32>
    %c0_8 = arith.constant 0 : index
    %c0_9 = arith.constant 0 : index
    %9 = vector.load %arg8[%c0_8, %c0_9] : memref<32x3xf32, #tpu.memory_space<vmem>>, vector<32x3xf32>
    %cst_10 = arith.constant dense<0.000000e+00> : vector<32x3xf32>
    %10 = tpu.matmul %8, %9, %cst_10 {dimension_numbers = #tpu.dot_dimension_numbers<[1], [0], [0], [1], [0, 0, 1, 1], [], []>} : vector<32x32xf32>, vector<32x3xf32>, vector<32x3xf32> -> vector<32x3xf32>
    %c0_11 = arith.constant 0 : index
    %c0_12 = arith.constant 0 : index
    %11 = vector.load %arg9[%c0_11, %c0_12] : memref<1x3xf32, #tpu.memory_space<vmem>>, vector<1x3xf32>
    %12 = vector.broadcast %11 : vector<1x3xf32> to vector<32x3xf32>
    %13 = arith.addf %10, %12 : vector<32x3xf32>
    %14 = tpu.iota {dimensions = array<i32: 1>} : vector<32x3xi32>
    %cst_13 = arith.constant dense<0x7F800000> : vector<32xf32>
    %15 = vector.multi_reduction <minimumf>, %13, %cst_13 [1] : vector<32x3xf32> to vector<32xf32>
    %16 = vector.shape_cast %15 : vector<32xf32> to vector<32x1xf32>
    %17 = vector.broadcast %16 : vector<32x1xf32> to vector<32x3xf32>
    %18 = arith.cmpf oeq, %13, %17 : vector<32x3xf32>
    %c-1_i32 = arith.constant -1 : i32
    %19 = vector.broadcast %c-1_i32 : i32 to vector<32x3xi32>
    %20 = arith.select %18, %14, %19 : vector<32x3xi1>, vector<32x3xi32>
    %cst_14 = arith.constant dense<-2147483648> : vector<32xi32>
    %21 = vector.multi_reduction <maxsi>, %20, %cst_14 [1] : vector<32x3xi32> to vector<32xi32>
    %22 = vector.shape_cast %21 : vector<32xi32> to vector<32x1xi32>
    %23 = vector.broadcast %22 : vector<32x1xi32> to vector<32x3xi32>
    %24 = arith.cmpi ne, %14, %23 : vector<32x3xi32>
    %cst_15 = arith.constant 0xFF800000 : f32
    %25 = vector.broadcast %cst_15 : f32 to vector<32x3xf32>
    %26 = arith.select %24, %13, %25 : vector<32x3xi1>, vector<32x3xf32>
    %cst_16 = arith.constant dense<0xFF800000> : vector<32xf32>
    %27 = vector.multi_reduction <maximumf>, %26, %cst_16 [1] : vector<32x3xf32> to vector<32xf32>
    %28 = vector.shape_cast %27 : vector<32xf32> to vector<32x1xf32>
    %29 = vector.broadcast %28 : vector<32x1xf32> to vector<32x3xf32>
    %30 = arith.subf %26, %29 : vector<32x3xf32>
    %31 = math.exp %30 : vector<32x3xf32>
    %cst_17 = arith.constant 0.000000e+00 : f32
    %32 = vector.broadcast %cst_17 : f32 to vector<32x3xf32>
    %33 = arith.select %24, %31, %32 : vector<32x3xi1>, vector<32x3xf32>
    %cst_18 = arith.constant dense<0.000000e+00> : vector<32xf32>
    %34 = vector.multi_reduction <add>, %33, %cst_18 [1] : vector<32x3xf32> to vector<32xf32>
    %35 = vector.shape_cast %34 : vector<32xf32> to vector<32x1xf32>
    %36 = vector.broadcast %35 : vector<32x1xf32> to vector<32x3xf32>
    %37 = arith.divf %33, %36 : vector<32x3xf32>
    %c0_19 = arith.constant 0 : index
    %c0_20 = arith.constant 0 : index
    %38 = vector.load %arg3[%c0_19, %c0_20] : memref<32x16xf32, #tpu.memory_space<vmem>>, vector<32x16xf32>
    %cst_21 = arith.constant dense<0.000000e+00> : vector<32x16xf32>
    %39 = tpu.matmul %38, %1, %cst_21 {dimension_numbers = #tpu.dot_dimension_numbers<[1], [0], [0], [1], [0, 0, 1, 1], [], []>} : vector<32x16xf32>, vector<16x16xf32>, vector<32x16xf32> -> vector<32x16xf32>
    %40 = vector.extract_strided_slice %39 {offsets = [0, 0], sizes = [16, 16], strides = [1, 1]} : vector<32x16xf32> to vector<16x16xf32>
    %41 = vector.extract_strided_slice %39 {offsets = [16, 0], sizes = [16, 16], strides = [1, 1]} : vector<32x16xf32> to vector<16x16xf32>
    %c0_22 = arith.constant 0 : index
    %c0_23 = arith.constant 0 : index
    %42 = vector.load %arg4[%c0_22, %c0_23] : memref<16x16xf32, #tpu.memory_space<vmem>>, vector<16x16xf32>
    %cst_24 = arith.constant -3.000000e+38 : f32
    %43 = vector.broadcast %cst_24 : f32 to vector<16x16xf32>
    %44 = vector.extract_strided_slice %42 {offsets = [0, 0], sizes = [16, 1], strides = [1, 1]} : vector<16x16xf32> to vector<16x1xf32>
    %cst_25 = arith.constant 0.000000e+00 : f32
    %45 = vector.broadcast %cst_25 : f32 to vector<16x1xf32>
    %46 = arith.cmpf ogt, %44, %45 : vector<16x1xf32>
    %47 = vector.extract_strided_slice %1 {offsets = [0, 0], sizes = [1, 16], strides = [1, 1]} : vector<16x16xf32> to vector<1x16xf32>
    %cst_26 = arith.constant -3.000000e+38 : f32
    %48 = vector.shape_cast %46 : vector<16x1xi1> to vector<16x1xi1>
    %49 = vector.broadcast %48 : vector<16x1xi1> to vector<16x16xi1>
    %50 = vector.shape_cast %47 : vector<1x16xf32> to vector<1x16xf32>
    %51 = vector.broadcast %50 : vector<1x16xf32> to vector<16x16xf32>
    %52 = vector.broadcast %cst_26 : f32 to vector<16x16xf32>
    %53 = arith.select %49, %51, %52 : vector<16x16xi1>, vector<16x16xf32>
    %54 = arith.maximumf %43, %53 : vector<16x16xf32>
    %55 = vector.extract_strided_slice %42 {offsets = [0, 1], sizes = [16, 1], strides = [1, 1]} : vector<16x16xf32> to vector<16x1xf32>
    %cst_27 = arith.constant 0.000000e+00 : f32
    %56 = vector.broadcast %cst_27 : f32 to vector<16x1xf32>
    %57 = arith.cmpf ogt, %55, %56 : vector<16x1xf32>
    %58 = vector.extract_strided_slice %1 {offsets = [1, 0], sizes = [1, 16], strides = [1, 1]} : vector<16x16xf32> to vector<1x16xf32>
    %cst_28 = arith.constant -3.000000e+38 : f32
    %59 = vector.shape_cast %57 : vector<16x1xi1> to vector<16x1xi1>
    %60 = vector.broadcast %59 : vector<16x1xi1> to vector<16x16xi1>
    %61 = vector.shape_cast %58 : vector<1x16xf32> to vector<1x16xf32>
    %62 = vector.broadcast %61 : vector<1x16xf32> to vector<16x16xf32>
    %63 = vector.broadcast %cst_28 : f32 to vector<16x16xf32>
    %64 = arith.select %60, %62, %63 : vector<16x16xi1>, vector<16x16xf32>
    %65 = arith.maximumf %54, %64 : vector<16x16xf32>
    %66 = vector.extract_strided_slice %42 {offsets = [0, 2], sizes = [16, 1], strides = [1, 1]} : vector<16x16xf32> to vector<16x1xf32>
    %cst_29 = arith.constant 0.000000e+00 : f32
    %67 = vector.broadcast %cst_29 : f32 to vector<16x1xf32>
    %68 = arith.cmpf ogt, %66, %67 : vector<16x1xf32>
    %69 = vector.extract_strided_slice %1 {offsets = [2, 0], sizes = [1, 16], strides = [1, 1]} : vector<16x16xf32> to vector<1x16xf32>
    %cst_30 = arith.constant -3.000000e+38 : f32
    %70 = vector.shape_cast %68 : vector<16x1xi1> to vector<16x1xi1>
    %71 = vector.broadcast %70 : vector<16x1xi1> to vector<16x16xi1>
    %72 = vector.shape_cast %69 : vector<1x16xf32> to vector<1x16xf32>
    %73 = vector.broadcast %72 : vector<1x16xf32> to vector<16x16xf32>
    %74 = vector.broadcast %cst_30 : f32 to vector<16x16xf32>
    %75 = arith.select %71, %73, %74 : vector<16x16xi1>, vector<16x16xf32>
    %76 = arith.maximumf %65, %75 : vector<16x16xf32>
    %77 = vector.extract_strided_slice %42 {offsets = [0, 3], sizes = [16, 1], strides = [1, 1]} : vector<16x16xf32> to vector<16x1xf32>
    %cst_31 = arith.constant 0.000000e+00 : f32
    %78 = vector.broadcast %cst_31 : f32 to vector<16x1xf32>
    %79 = arith.cmpf ogt, %77, %78 : vector<16x1xf32>
    %80 = vector.extract_strided_slice %1 {offsets = [3, 0], sizes = [1, 16], strides = [1, 1]} : vector<16x16xf32> to vector<1x16xf32>
    %cst_32 = arith.constant -3.000000e+38 : f32
    %81 = vector.shape_cast %79 : vector<16x1xi1> to vector<16x1xi1>
    %82 = vector.broadcast %81 : vector<16x1xi1> to vector<16x16xi1>
    %83 = vector.shape_cast %80 : vector<1x16xf32> to vector<1x16xf32>
    %84 = vector.broadcast %83 : vector<1x16xf32> to vector<16x16xf32>
    %85 = vector.broadcast %cst_32 : f32 to vector<16x16xf32>
    %86 = arith.select %82, %84, %85 : vector<16x16xi1>, vector<16x16xf32>
    %87 = arith.maximumf %76, %86 : vector<16x16xf32>
    %88 = vector.extract_strided_slice %42 {offsets = [0, 4], sizes = [16, 1], strides = [1, 1]} : vector<16x16xf32> to vector<16x1xf32>
    %cst_33 = arith.constant 0.000000e+00 : f32
    %89 = vector.broadcast %cst_33 : f32 to vector<16x1xf32>
    %90 = arith.cmpf ogt, %88, %89 : vector<16x1xf32>
    %91 = vector.extract_strided_slice %1 {offsets = [4, 0], sizes = [1, 16], strides = [1, 1]} : vector<16x16xf32> to vector<1x16xf32>
    %cst_34 = arith.constant -3.000000e+38 : f32
    %92 = vector.shape_cast %90 : vector<16x1xi1> to vector<16x1xi1>
    %93 = vector.broadcast %92 : vector<16x1xi1> to vector<16x16xi1>
    %94 = vector.shape_cast %91 : vector<1x16xf32> to vector<1x16xf32>
    %95 = vector.broadcast %94 : vector<1x16xf32> to vector<16x16xf32>
    %96 = vector.broadcast %cst_34 : f32 to vector<16x16xf32>
    %97 = arith.select %93, %95, %96 : vector<16x16xi1>, vector<16x16xf32>
    %98 = arith.maximumf %87, %97 : vector<16x16xf32>
    %99 = vector.extract_strided_slice %42 {offsets = [0, 5], sizes = [16, 1], strides = [1, 1]} : vector<16x16xf32> to vector<16x1xf32>
    %cst_35 = arith.constant 0.000000e+00 : f32
    %100 = vector.broadcast %cst_35 : f32 to vector<16x1xf32>
    %101 = arith.cmpf ogt, %99, %100 : vector<16x1xf32>
    %102 = vector.extract_strided_slice %1 {offsets = [5, 0], sizes = [1, 16], strides = [1, 1]} : vector<16x16xf32> to vector<1x16xf32>
    %cst_36 = arith.constant -3.000000e+38 : f32
    %103 = vector.shape_cast %101 : vector<16x1xi1> to vector<16x1xi1>
    %104 = vector.broadcast %103 : vector<16x1xi1> to vector<16x16xi1>
    %105 = vector.shape_cast %102 : vector<1x16xf32> to vector<1x16xf32>
    %106 = vector.broadcast %105 : vector<1x16xf32> to vector<16x16xf32>
    %107 = vector.broadcast %cst_36 : f32 to vector<16x16xf32>
    %108 = arith.select %104, %106, %107 : vector<16x16xi1>, vector<16x16xf32>
    %109 = arith.maximumf %98, %108 : vector<16x16xf32>
    %110 = vector.extract_strided_slice %42 {offsets = [0, 6], sizes = [16, 1], strides = [1, 1]} : vector<16x16xf32> to vector<16x1xf32>
    %cst_37 = arith.constant 0.000000e+00 : f32
    %111 = vector.broadcast %cst_37 : f32 to vector<16x1xf32>
    %112 = arith.cmpf ogt, %110, %111 : vector<16x1xf32>
    %113 = vector.extract_strided_slice %1 {offsets = [6, 0], sizes = [1, 16], strides = [1, 1]} : vector<16x16xf32> to vector<1x16xf32>
    %cst_38 = arith.constant -3.000000e+38 : f32
    %114 = vector.shape_cast %112 : vector<16x1xi1> to vector<16x1xi1>
    %115 = vector.broadcast %114 : vector<16x1xi1> to vector<16x16xi1>
    %116 = vector.shape_cast %113 : vector<1x16xf32> to vector<1x16xf32>
    %117 = vector.broadcast %116 : vector<1x16xf32> to vector<16x16xf32>
    %118 = vector.broadcast %cst_38 : f32 to vector<16x16xf32>
    %119 = arith.select %115, %117, %118 : vector<16x16xi1>, vector<16x16xf32>
    %120 = arith.maximumf %109, %119 : vector<16x16xf32>
    %121 = vector.extract_strided_slice %42 {offsets = [0, 7], sizes = [16, 1], strides = [1, 1]} : vector<16x16xf32> to vector<16x1xf32>
    %cst_39 = arith.constant 0.000000e+00 : f32
    %122 = vector.broadcast %cst_39 : f32 to vector<16x1xf32>
    %123 = arith.cmpf ogt, %121, %122 : vector<16x1xf32>
    %124 = vector.extract_strided_slice %1 {offsets = [7, 0], sizes = [1, 16], strides = [1, 1]} : vector<16x16xf32> to vector<1x16xf32>
    %cst_40 = arith.constant -3.000000e+38 : f32
    %125 = vector.shape_cast %123 : vector<16x1xi1> to vector<16x1xi1>
    %126 = vector.broadcast %125 : vector<16x1xi1> to vector<16x16xi1>
    %127 = vector.shape_cast %124 : vector<1x16xf32> to vector<1x16xf32>
    %128 = vector.broadcast %127 : vector<1x16xf32> to vector<16x16xf32>
    %129 = vector.broadcast %cst_40 : f32 to vector<16x16xf32>
    %130 = arith.select %126, %128, %129 : vector<16x16xi1>, vector<16x16xf32>
    %131 = arith.maximumf %120, %130 : vector<16x16xf32>
    %132 = vector.extract_strided_slice %42 {offsets = [0, 8], sizes = [16, 1], strides = [1, 1]} : vector<16x16xf32> to vector<16x1xf32>
    %cst_41 = arith.constant 0.000000e+00 : f32
    %133 = vector.broadcast %cst_41 : f32 to vector<16x1xf32>
    %134 = arith.cmpf ogt, %132, %133 : vector<16x1xf32>
    %135 = vector.extract_strided_slice %1 {offsets = [8, 0], sizes = [1, 16], strides = [1, 1]} : vector<16x16xf32> to vector<1x16xf32>
    %cst_42 = arith.constant -3.000000e+38 : f32
    %136 = vector.shape_cast %134 : vector<16x1xi1> to vector<16x1xi1>
    %137 = vector.broadcast %136 : vector<16x1xi1> to vector<16x16xi1>
    %138 = vector.shape_cast %135 : vector<1x16xf32> to vector<1x16xf32>
    %139 = vector.broadcast %138 : vector<1x16xf32> to vector<16x16xf32>
    %140 = vector.broadcast %cst_42 : f32 to vector<16x16xf32>
    %141 = arith.select %137, %139, %140 : vector<16x16xi1>, vector<16x16xf32>
    %142 = arith.maximumf %131, %141 : vector<16x16xf32>
    %143 = vector.extract_strided_slice %42 {offsets = [0, 9], sizes = [16, 1], strides = [1, 1]} : vector<16x16xf32> to vector<16x1xf32>
    %cst_43 = arith.constant 0.000000e+00 : f32
    %144 = vector.broadcast %cst_43 : f32 to vector<16x1xf32>
    %145 = arith.cmpf ogt, %143, %144 : vector<16x1xf32>
    %146 = vector.extract_strided_slice %1 {offsets = [9, 0], sizes = [1, 16], strides = [1, 1]} : vector<16x16xf32> to vector<1x16xf32>
    %cst_44 = arith.constant -3.000000e+38 : f32
    %147 = vector.shape_cast %145 : vector<16x1xi1> to vector<16x1xi1>
    %148 = vector.broadcast %147 : vector<16x1xi1> to vector<16x16xi1>
    %149 = vector.shape_cast %146 : vector<1x16xf32> to vector<1x16xf32>
    %150 = vector.broadcast %149 : vector<1x16xf32> to vector<16x16xf32>
    %151 = vector.broadcast %cst_44 : f32 to vector<16x16xf32>
    %152 = arith.select %148, %150, %151 : vector<16x16xi1>, vector<16x16xf32>
    %153 = arith.maximumf %142, %152 : vector<16x16xf32>
    %154 = vector.extract_strided_slice %42 {offsets = [0, 10], sizes = [16, 1], strides = [1, 1]} : vector<16x16xf32> to vector<16x1xf32>
    %cst_45 = arith.constant 0.000000e+00 : f32
    %155 = vector.broadcast %cst_45 : f32 to vector<16x1xf32>
    %156 = arith.cmpf ogt, %154, %155 : vector<16x1xf32>
    %157 = vector.extract_strided_slice %1 {offsets = [10, 0], sizes = [1, 16], strides = [1, 1]} : vector<16x16xf32> to vector<1x16xf32>
    %cst_46 = arith.constant -3.000000e+38 : f32
    %158 = vector.shape_cast %156 : vector<16x1xi1> to vector<16x1xi1>
    %159 = vector.broadcast %158 : vector<16x1xi1> to vector<16x16xi1>
    %160 = vector.shape_cast %157 : vector<1x16xf32> to vector<1x16xf32>
    %161 = vector.broadcast %160 : vector<1x16xf32> to vector<16x16xf32>
    %162 = vector.broadcast %cst_46 : f32 to vector<16x16xf32>
    %163 = arith.select %159, %161, %162 : vector<16x16xi1>, vector<16x16xf32>
    %164 = arith.maximumf %153, %163 : vector<16x16xf32>
    %165 = vector.extract_strided_slice %42 {offsets = [0, 11], sizes = [16, 1], strides = [1, 1]} : vector<16x16xf32> to vector<16x1xf32>
    %cst_47 = arith.constant 0.000000e+00 : f32
    %166 = vector.broadcast %cst_47 : f32 to vector<16x1xf32>
    %167 = arith.cmpf ogt, %165, %166 : vector<16x1xf32>
    %168 = vector.extract_strided_slice %1 {offsets = [11, 0], sizes = [1, 16], strides = [1, 1]} : vector<16x16xf32> to vector<1x16xf32>
    %cst_48 = arith.constant -3.000000e+38 : f32
    %169 = vector.shape_cast %167 : vector<16x1xi1> to vector<16x1xi1>
    %170 = vector.broadcast %169 : vector<16x1xi1> to vector<16x16xi1>
    %171 = vector.shape_cast %168 : vector<1x16xf32> to vector<1x16xf32>
    %172 = vector.broadcast %171 : vector<1x16xf32> to vector<16x16xf32>
    %173 = vector.broadcast %cst_48 : f32 to vector<16x16xf32>
    %174 = arith.select %170, %172, %173 : vector<16x16xi1>, vector<16x16xf32>
    %175 = arith.maximumf %164, %174 : vector<16x16xf32>
    %176 = vector.extract_strided_slice %42 {offsets = [0, 12], sizes = [16, 1], strides = [1, 1]} : vector<16x16xf32> to vector<16x1xf32>
    %cst_49 = arith.constant 0.000000e+00 : f32
    %177 = vector.broadcast %cst_49 : f32 to vector<16x1xf32>
    %178 = arith.cmpf ogt, %176, %177 : vector<16x1xf32>
    %179 = vector.extract_strided_slice %1 {offsets = [12, 0], sizes = [1, 16], strides = [1, 1]} : vector<16x16xf32> to vector<1x16xf32>
    %cst_50 = arith.constant -3.000000e+38 : f32
    %180 = vector.shape_cast %178 : vector<16x1xi1> to vector<16x1xi1>
    %181 = vector.broadcast %180 : vector<16x1xi1> to vector<16x16xi1>
    %182 = vector.shape_cast %179 : vector<1x16xf32> to vector<1x16xf32>
    %183 = vector.broadcast %182 : vector<1x16xf32> to vector<16x16xf32>
    %184 = vector.broadcast %cst_50 : f32 to vector<16x16xf32>
    %185 = arith.select %181, %183, %184 : vector<16x16xi1>, vector<16x16xf32>
    %186 = arith.maximumf %175, %185 : vector<16x16xf32>
    %187 = vector.extract_strided_slice %42 {offsets = [0, 13], sizes = [16, 1], strides = [1, 1]} : vector<16x16xf32> to vector<16x1xf32>
    %cst_51 = arith.constant 0.000000e+00 : f32
    %188 = vector.broadcast %cst_51 : f32 to vector<16x1xf32>
    %189 = arith.cmpf ogt, %187, %188 : vector<16x1xf32>
    %190 = vector.extract_strided_slice %1 {offsets = [13, 0], sizes = [1, 16], strides = [1, 1]} : vector<16x16xf32> to vector<1x16xf32>
    %cst_52 = arith.constant -3.000000e+38 : f32
    %191 = vector.shape_cast %189 : vector<16x1xi1> to vector<16x1xi1>
    %192 = vector.broadcast %191 : vector<16x1xi1> to vector<16x16xi1>
    %193 = vector.shape_cast %190 : vector<1x16xf32> to vector<1x16xf32>
    %194 = vector.broadcast %193 : vector<1x16xf32> to vector<16x16xf32>
    %195 = vector.broadcast %cst_52 : f32 to vector<16x16xf32>
    %196 = arith.select %192, %194, %195 : vector<16x16xi1>, vector<16x16xf32>
    %197 = arith.maximumf %186, %196 : vector<16x16xf32>
    %198 = vector.extract_strided_slice %42 {offsets = [0, 14], sizes = [16, 1], strides = [1, 1]} : vector<16x16xf32> to vector<16x1xf32>
    %cst_53 = arith.constant 0.000000e+00 : f32
    %199 = vector.broadcast %cst_53 : f32 to vector<16x1xf32>
    %200 = arith.cmpf ogt, %198, %199 : vector<16x1xf32>
    %201 = vector.extract_strided_slice %1 {offsets = [14, 0], sizes = [1, 16], strides = [1, 1]} : vector<16x16xf32> to vector<1x16xf32>
    %cst_54 = arith.constant -3.000000e+38 : f32
    %202 = vector.shape_cast %200 : vector<16x1xi1> to vector<16x1xi1>
    %203 = vector.broadcast %202 : vector<16x1xi1> to vector<16x16xi1>
    %204 = vector.shape_cast %201 : vector<1x16xf32> to vector<1x16xf32>
    %205 = vector.broadcast %204 : vector<1x16xf32> to vector<16x16xf32>
    %206 = vector.broadcast %cst_54 : f32 to vector<16x16xf32>
    %207 = arith.select %203, %205, %206 : vector<16x16xi1>, vector<16x16xf32>
    %208 = arith.maximumf %197, %207 : vector<16x16xf32>
    %209 = vector.extract_strided_slice %42 {offsets = [0, 15], sizes = [16, 1], strides = [1, 1]} : vector<16x16xf32> to vector<16x1xf32>
    %cst_55 = arith.constant 0.000000e+00 : f32
    %210 = vector.broadcast %cst_55 : f32 to vector<16x1xf32>
    %211 = arith.cmpf ogt, %209, %210 : vector<16x1xf32>
    %212 = vector.extract_strided_slice %1 {offsets = [15, 0], sizes = [1, 16], strides = [1, 1]} : vector<16x16xf32> to vector<1x16xf32>
    %cst_56 = arith.constant -3.000000e+38 : f32
    %213 = vector.shape_cast %211 : vector<16x1xi1> to vector<16x1xi1>
    %214 = vector.broadcast %213 : vector<16x1xi1> to vector<16x16xi1>
    %215 = vector.shape_cast %212 : vector<1x16xf32> to vector<1x16xf32>
    %216 = vector.broadcast %215 : vector<1x16xf32> to vector<16x16xf32>
    %217 = vector.broadcast %cst_56 : f32 to vector<16x16xf32>
    %218 = arith.select %214, %216, %217 : vector<16x16xi1>, vector<16x16xf32>
    %219 = arith.maximumf %208, %218 : vector<16x16xf32>
    %c0_57 = arith.constant 0 : index
    %c0_58 = arith.constant 0 : index
    %220 = vector.load %arg5[%c0_57, %c0_58] : memref<16x1xf32, #tpu.memory_space<vmem>>, vector<16x1xf32>
    %cst_59 = arith.constant 0.000000e+00 : f32
    %221 = vector.broadcast %cst_59 : f32 to vector<16x1xf32>
    %222 = arith.cmpf ogt, %220, %221 : vector<16x1xf32>
    %cst_60 = arith.constant 0.000000e+00 : f32
    %223 = vector.shape_cast %222 : vector<16x1xi1> to vector<16x1xi1>
    %224 = vector.broadcast %223 : vector<16x1xi1> to vector<16x16xi1>
    %225 = vector.broadcast %cst_60 : f32 to vector<16x16xf32>
    %226 = arith.select %224, %219, %225 : vector<16x16xi1>, vector<16x16xf32>
    %227 = vector.extract_strided_slice %40 {offsets = [0, 0], sizes = [16, 8], strides = [1, 1]} : vector<16x16xf32> to vector<16x8xf32>
    %228 = vector.extract_strided_slice %40 {offsets = [0, 8], sizes = [16, 8], strides = [1, 1]} : vector<16x16xf32> to vector<16x8xf32>
    %229 = tpu.concatenate %227, %228 in 0 : vector<16x8xf32>, vector<16x8xf32> -> vector<32x8xf32>
    %230 = vector.extract_strided_slice %41 {offsets = [0, 0], sizes = [16, 8], strides = [1, 1]} : vector<16x16xf32> to vector<16x8xf32>
    %231 = vector.extract_strided_slice %41 {offsets = [0, 8], sizes = [16, 8], strides = [1, 1]} : vector<16x16xf32> to vector<16x8xf32>
    %232 = tpu.concatenate %230, %231 in 0 : vector<16x8xf32>, vector<16x8xf32> -> vector<32x8xf32>
    %233 = vector.extract_strided_slice %226 {offsets = [0, 0], sizes = [16, 8], strides = [1, 1]} : vector<16x16xf32> to vector<16x8xf32>
    %234 = vector.extract_strided_slice %226 {offsets = [0, 8], sizes = [16, 8], strides = [1, 1]} : vector<16x16xf32> to vector<16x8xf32>
    %235 = tpu.concatenate %233, %234 in 0 : vector<16x8xf32>, vector<16x8xf32> -> vector<32x8xf32>
    %236 = vector.extract_strided_slice %37 {offsets = [0, 0], sizes = [32, 1], strides = [1, 1]} : vector<32x3xf32> to vector<32x1xf32>
    %237 = vector.extract_strided_slice %37 {offsets = [0, 1], sizes = [32, 1], strides = [1, 1]} : vector<32x3xf32> to vector<32x1xf32>
    %238 = vector.extract_strided_slice %37 {offsets = [0, 2], sizes = [32, 1], strides = [1, 1]} : vector<32x3xf32> to vector<32x1xf32>
    %239 = vector.broadcast %236 : vector<32x1xf32> to vector<32x8xf32>
    %240 = arith.mulf %239, %229 : vector<32x8xf32>
    %241 = vector.broadcast %237 : vector<32x1xf32> to vector<32x8xf32>
    %242 = arith.mulf %241, %232 : vector<32x8xf32>
    %243 = vector.broadcast %238 : vector<32x1xf32> to vector<32x8xf32>
    %244 = arith.mulf %243, %235 : vector<32x8xf32>
    %245 = tpu.concatenate %240, %242, %244 in 1 : vector<32x8xf32>, vector<32x8xf32>, vector<32x8xf32> -> vector<32x24xf32>
    %c0_61 = arith.constant 0 : index
    %c0_62 = arith.constant 0 : index
    %246 = vector.load %arg11[%c0_61, %c0_62] : memref<3x8xf32, #tpu.memory_space<vmem>>, vector<1x8xf32>
    %247 = vector.broadcast %236 : vector<32x1xf32> to vector<32x8xf32>
    %248 = vector.broadcast %246 : vector<1x8xf32> to vector<32x8xf32>
    %249 = arith.mulf %247, %248 : vector<32x8xf32>
    %c1 = arith.constant 1 : index
    %c0_63 = arith.constant 0 : index
    %250 = vector.load %arg11[%c1, %c0_63] : memref<3x8xf32, #tpu.memory_space<vmem>>, vector<1x8xf32>
    %251 = vector.broadcast %237 : vector<32x1xf32> to vector<32x8xf32>
    %252 = vector.broadcast %250 : vector<1x8xf32> to vector<32x8xf32>
    %253 = arith.mulf %251, %252 : vector<32x8xf32>
    %254 = arith.addf %249, %253 : vector<32x8xf32>
    %c2 = arith.constant 2 : index
    %c0_64 = arith.constant 0 : index
    %255 = vector.load %arg11[%c2, %c0_64] : memref<3x8xf32, #tpu.memory_space<vmem>>, vector<1x8xf32>
    %256 = vector.broadcast %238 : vector<32x1xf32> to vector<32x8xf32>
    %257 = vector.broadcast %255 : vector<1x8xf32> to vector<32x8xf32>
    %258 = arith.mulf %256, %257 : vector<32x8xf32>
    %259 = arith.addf %254, %258 : vector<32x8xf32>
    %c0_65 = arith.constant 0 : index
    %c0_66 = arith.constant 0 : index
    %260 = vector.load %arg10[%c0_65, %c0_66] : memref<24x8xf32, #tpu.memory_space<vmem>>, vector<24x8xf32>
    %cst_67 = arith.constant dense<0.000000e+00> : vector<32x8xf32>
    %261 = tpu.matmul %245, %260, %cst_67 {dimension_numbers = #tpu.dot_dimension_numbers<[1], [0], [0], [1], [0, 0, 1, 1], [], []>} : vector<32x24xf32>, vector<24x8xf32>, vector<32x8xf32> -> vector<32x8xf32>
    %262 = arith.addf %261, %259 : vector<32x8xf32>
    %263 = vector.extract_strided_slice %262 {offsets = [0, 0], sizes = [16, 8], strides = [1, 1]} : vector<32x8xf32> to vector<16x8xf32>
    %264 = vector.extract_strided_slice %262 {offsets = [16, 0], sizes = [16, 8], strides = [1, 1]} : vector<32x8xf32> to vector<16x8xf32>
    %265 = tpu.concatenate %263, %264 in 1 : vector<16x8xf32>, vector<16x8xf32> -> vector<16x16xf32>
    %cst_68 = arith.constant 0.000000e+00 : f32
    %266 = vector.broadcast %cst_68 : f32 to vector<16x16xf32>
    %267 = arith.cmpf oeq, %1, %266 : vector<16x16xf32>
    %268 = arith.extui %267 : vector<16x16xi1> to vector<16x16xi32>
    %269 = arith.sitofp %268 : vector<16x16xi32> to vector<16x16xf32>
    %cst_69 = arith.constant 1.000000e+00 : f32
    %270 = vector.broadcast %cst_69 : f32 to vector<16x16xf32>
    %271 = arith.subf %270, %269 : vector<16x16xf32>
    %272 = arith.mulf %1, %271 : vector<16x16xf32>
    %273 = arith.mulf %265, %269 : vector<16x16xf32>
    %274 = arith.addf %272, %273 : vector<16x16xf32>
    %c0_70 = arith.constant 0 : index
    %c0_71 = arith.constant 0 : index
    %275 = vector.load %arg12[%c0_70, %c0_71] : memref<16x16xf32, #tpu.memory_space<vmem>>, vector<16x16xf32>
    tpu.vector_store %arg12[%c0_70, %c0_71], %274 {strides = array<i32>} : memref<16x16xf32, #tpu.memory_space<vmem>>, vector<16x16xf32>,
    return
  }
  func.func @transform_0(%arg0: i32) -> (i32, i32) {
    %c0_i32 = arith.constant 0 : i32
    %c0_i32_0 = arith.constant 0 : i32
    %c0_i32_1 = arith.constant 0 : i32
    return %c0_i32, %c0_i32_0 : i32, i32
  }
  func.func @transform_1(%arg0: i32) -> (i32, i32) {
    %c0_i32 = arith.constant 0 : i32
    %c0_i32_0 = arith.constant 0 : i32
    %c0_i32_1 = arith.constant 0 : i32
    return %c0_i32, %c0_i32_0 : i32, i32
  }
  func.func @transform_2(%arg0: i32) -> (i32, i32) {
    %c0_i32 = arith.constant 0 : i32
    %c0_i32_0 = arith.constant 0 : i32
    %c0_i32_1 = arith.constant 0 : i32
    return %c0_i32, %c0_i32_0 : i32, i32
  }
  func.func @transform_3(%arg0: i32) -> (i32, i32) {
    %c0_i32 = arith.constant 0 : i32
    %c0_i32_0 = arith.constant 0 : i32
    %c0_i32_1 = arith.constant 0 : i32
    return %c0_i32, %c0_i32_0 : i32, i32
  }
  func.func @transform_4(%arg0: i32) -> (i32, i32) {
    %c0_i32 = arith.constant 0 : i32
    %c0_i32_0 = arith.constant 0 : i32
    %c0_i32_1 = arith.constant 0 : i32
    return %c0_i32, %c0_i32_0 : i32, i32
  }
  func.func @transform_5(%arg0: i32) -> (i32, i32) {
    %c0_i32 = arith.constant 0 : i32
    %c0_i32_0 = arith.constant 0 : i32
    %c0_i32_1 = arith.constant 0 : i32
    return %c0_i32, %c0_i32_0 : i32, i32
  }
  func.func @transform_6(%arg0: i32) -> (i32, i32) {
    %c0_i32 = arith.constant 0 : i32
    %c0_i32_0 = arith.constant 0 : i32
    %c0_i32_1 = arith.constant 0 : i32
    return %c0_i32, %c0_i32_0 : i32, i32
  }
  func.func @transform_7(%arg0: i32) -> (i32, i32) {
    %c0_i32 = arith.constant 0 : i32
    %c0_i32_0 = arith.constant 0 : i32
    %c0_i32_1 = arith.constant 0 : i32
    return %c0_i32, %c0_i32_0 : i32, i32
  }
  func.func @transform_8(%arg0: i32) -> (i32, i32) {
    %c0_i32 = arith.constant 0 : i32
    %c0_i32_0 = arith.constant 0 : i32
    %c0_i32_1 = arith.constant 0 : i32
    return %c0_i32, %c0_i32_0 : i32, i32
  }
  func.func @transform_9(%arg0: i32) -> (i32, i32) {
    %c0_i32 = arith.constant 0 : i32
    %c0_i32_0 = arith.constant 0 : i32
    %c0_i32_1 = arith.constant 0 : i32
    return %c0_i32, %c0_i32_0 : i32, i32
  }
  func.func @transform_10(%arg0: i32) -> (i32, i32) {
    %c0_i32 = arith.constant 0 : i32
    %c0_i32_0 = arith.constant 0 : i32
    %c0_i32_1 = arith.constant 0 : i32
    return %c0_i32, %c0_i32_0 : i32, i32
  }
  func.func @transform_11(%arg0: i32) -> (i32, i32) {
    %c0_i32 = arith.constant 0 : i32
    %c0_i32_0 = arith.constant 0 : i32
    %c0_i32_1 = arith.constant 0 : i32
    return %c0_i32, %c0_i32_0 : i32, i32
  }
}

</mosaic_0001>

<bundles_post_ra>
// kernel: tpu_custom_call.1
= control target key start
LH: loop header
LB: loop body
LE: loop exit
PB: predicated region body
PF: predicated region fallthrough
CT: control target
= control target key end

     0   :  { %vm53_vm0 = vcmask 64512   ;;  %s1837_s0 = inlined_call_operand.vmem [shape: f32[32,8], index: 0, kind: input, shape index: {}]   ;;  %s1838_s1 = inlined_call_operand.vmem [shape: f32[16,16], index: 1, kind: input, shape index: {}]   ;;  %s1839_s2 = inlined_call_operand.vmem [shape: f32[32,16], index: 2, kind: input, shape index: {}]   ;;  %s1840_s3 = inlined_call_operand.vmem [shape: f32[16,16], index: 3, kind: input, shape index: {}]   ;;  %s1841_s4 = inlined_call_operand.vmem [shape: f32[16,1], index: 4, kind: input, shape index: {}]   ;;  %s1842_s5 = inlined_call_operand.vmem [shape: f32[8,32], index: 5, kind: input, shape index: {}]   ;;  %s1843_s6 = inlined_call_operand.vmem [shape: f32[1,32], index: 6, kind: input, shape index: {}]   ;;  %s1844_s7 = inlined_call_operand.vmem [shape: f32[32,3], index: 7, kind: input, shape index: {}]   ;;  %s1845_s8 = inlined_call_operand.vmem [shape: f32[1,3], index: 8, kind: input, shape index: {}]   ;;  %s1846_s9 = inlined_call_operand.vmem [shape: f32[24,8], index: 9, kind: input, shape index: {}]   ;;  %s1847_s10 = inlined_call_operand.vmem [shape: f32[3,8], index: 10, kind: input, shape index: {}]   ;;  %s1848_s11 = inlined_call_operand.hbm [shape: f32[16,16], index: 11, kind: output, shape index: {}]  }
   0x1   :  { %v45_v0 = vld [vmem:[%s1842_s5] sm:$0xff]  ;;  %v40_v2 = vld [vmem:[%s1837_s0 + $0x8] sm:$0xff]  ;;  %v41_v3 = vld [vmem:[%s1837_s0 + $0x10] sm:$0xff] }
   0x2   :  { %v39_v1 = vld [vmem:[%s1837_s0] sm:$0xff]  ;;  %1138 = vmatprep.subr.mxu0 %v45_v0  ;;  %v156_v5 = vld [vmem:[%s1844_s7 + $0x8] sm:$0xff] }
   0x3   :  { %1140 = vmatprep.mubr.msk.f32.mxu0 %vm53_vm0, %v39_v1  ;;  %v155_v4 = vld [vmem:[%s1844_s7] sm:$0xff]  ;;  %1139 = vmatpush3.msra.mxu0 %v45_v0 }
   0x4   :  { %16 = vsyncpa [#allocation3], 0  ;;  %1141 = vmatmul.mubr.msk.f32.vlgmr.msra.gmra.mrb[0].mxu0 %vm53_vm0, %v40_v2  ;;  %v1182_v6 = vpack.c.bf16 %v156_v5, %v155_v4  ;;  %v42_v7 = vld [vmem:[%s1837_s0 + $0x18] sm:$0xff]  ;;  %v157_v8 = vld [vmem:[%s1844_s7 + $0x10] sm:$0xff]  ;;  %v1298_v13 = vmov 0   ;;  %v1299_v14 = vmov 3   ;;  %v264_v35 = vlaneseq }
   0x5   :  { %1143 = vmatprep.mubr.msk.f32.mxu0 %vm53_vm0, %v41_v3  ;;  %v158_v9 = vld [vmem:[%s1844_s7 + $0x18] sm:$0xff]  ;;  %v505_v11 = vld [vmem:[%s1840_s3] sm:$0xff]  ;;  %v506_v12 = vld [vmem:[%s1840_s3 + $0x8] sm:$0xff]  ;;  %1224 = vset.pattern.permute.xlu1 %v1298_v13  ;;  %v1300_v17 = vmov 1   ;;  %v1301_v18 = vmov 4   ;;  %v1302_v19 = vmov 2  }
   0x6   :  { %1183 = vmatprep.subr.bf16.mxu1 %v1182_v6  ;;  %v1186_v10 = vpack.c.bf16 %v158_v9, %v157_v8  ;;  %vm508_vm1 = vcmp.gt.f32.partialorder %v506_v12, 0.0  ;;  %1228 = vset.pattern.permute.xlu0 %v1299_v14  ;;  %vm507_vm2 = vcmp.gt.f32.partialorder %v505_v11, 0.0  ;;  %v1089_v20 = vld [vmem:[%s1843_s6] ss:$0 sm:$0xff]  ;;  %vm166_vm3 = vcmask 261120   ;;  %s1315_s13 = smov 8  }
   0x7   :  { %1185 = vmatpush3.bf16.msra.mxu1 %v1182_v6  ;;  %v1419_v15 = vsel %vm508_vm1, 1, %v1298_v13  ;;  %v1424_v16 = vsel %vm507_vm2, 1, %v1298_v13  ;;  %v1303_v33 = vmov 5   ;;  %v1439_v37 = vshrl.u32 %v264_v35, 7  ;;  %v1448_v41 = vld [vmem:[%s1838_s1] sm:$0xff]  ;;  %s1316_s7 = smov 16  }
   0x8   :  { %1144 = vmatmul.mubr.msk.f32.gmra.mrb[2].mxu0 %vm53_vm0, %v42_v7  ;;  %1187 = vmatprep.subr.bf16.mxu1 %v1186_v10  ;;  %v1094_v59 = vld [vmem:[%s1845_s8] ss:$0 sm:$0xff]  ;;  %vm266_vm8 = vcmask 23552   ;;  %v1499_v8 = vand.u32 127, %v264_v35  ;;  %s1318_s22 = smov [#allocation2]  }
   0x9   :  { %515 = vperm.xlu1 %1224, %v1419_v15   ;;  %563 = vperm.xlu0 %1228, %v1419_v15   ;;  %v553_v39 = vsub.s32 2, %v1439_v37  ;;  %v537_v40 = vsub.s32 1, %v1439_v37  ;;  %v569_v45 = vsub.s32 3, %v1439_v37  ;;  %v585_v50 = vsub.s32 4, %v1439_v37  ;;  %s1078_s23 = sshll.u32 %s1318_s22, 4  ;;  %s1079_s23 = int_to_ptr.vmem [resolvable:$true] %s1078_s23 }
   0xa   :  { %v601_v12 = vsub.s32 5, %v1439_v37  ;;  %p1279_p1 = scmp.lt.s32.totalorder %s1079_s23, %s1079_s23 }
   0xb   :  { %1189 = vmatpush3.bf16.msra.mxu1 %v1186_v10  ;;  %v1453_v43 = vrot.slane %v1448_v41, %v553_v39  ;;  %v1458_v44 = vrot.slane %v1448_v41, %v537_v40  ;;  %v1468_v49 = vrot.slane %v1448_v41, %v569_v45  ;;  %v1475_v54 = vrot.slane %v1448_v41, %v585_v50 }
   0xd   :  { %1225 = vset.pattern.permute.xlu1 %v1300_v17  ;;  %1230 = vset.pattern.permute.xlu0 %v1301_v18 }
   0xe   :  { %528 = vperm.xlu1 %1225, %v1424_v16  }
  0x12   :  { %531 = vperm.xlu1 %1225, %v1419_v15  }
  0x16   :  { %1226 = vset.pattern.permute.xlu1 %v1302_v19 }
  0x17   :  { %544 = vperm.xlu1 %1226, %v1424_v16  }
  0x1b   :  { %547 = vperm.xlu1 %1226, %v1419_v15  }
  0x1f   :  { %1227 = vset.pattern.permute.xlu1 %v1299_v14 }
  0x20   :  { %560 = vperm.xlu1 %1227, %v1424_v16  }
  0x24   :  { %1229 = vset.pattern.permute.xlu1 %v1301_v18 }
  0x25   :  { %576 = vperm.xlu1 %1229, %v1424_v16  }
  0x29   :  { %1231 = vset.pattern.permute.xlu1 %v1303_v33 }
  0x88   :  { %v1437_v34 = vpop.permute.xlu1 %515  ;;  %v1501_v9 = vpop.permute.xlu0 %563 }
  0x89   :  { %vm518_vm14 = vcmp.eq.s32.totalorder %v1437_v34, 1  ;;  %vm566_vm2 = vcmp.eq.s32.totalorder %v1501_v9, 1 }
  0x8d   :  { %v529_v36 = vpop.permute.xlu1 %528 }
  0x8e   :  { %vm533_vm4 = vcmp.eq.s32.totalorder %v529_v36, 1 }
  0x8f   :  { %v539_v46 = vsel %vm533_vm4, %v1458_v44, -3e+38 }
  0x91   :  { %v1441_v38 = vpop.permute.xlu1 %531 }
  0x92   :  { %vm534_vm15 = vcmp.eq.s32.totalorder %v1441_v38, 1 }
  0x96   :  { %v545_v42 = vpop.permute.xlu1 %544 }
  0x97   :  { %vm549_vm5 = vcmp.eq.s32.totalorder %v545_v42, 1 }
  0x98   :  { %v555_v47 = vsel %vm549_vm5, %v1453_v43, -3e+38 }
  0x99   :  { %v541_v51 = vmax.f32 %v555_v47, %v539_v46 }
  0x9a   :  { %v1463_v48 = vpop.permute.xlu1 %547 }
  0x9b   :  { %vm550_vm1 = vcmp.eq.s32.totalorder %v1463_v48, 1 }
  0x9f   :  { %v561_v52 = vpop.permute.xlu1 %560 }
  0xa0   :  { %vm565_vm6 = vcmp.eq.s32.totalorder %v561_v52, 1  ;;  %v1304_v52 = vmov 6  }
  0xa1   :  { %v571_v53 = vsel %vm565_vm6, %v1468_v49, -3e+38 }
  0xa2   :  { %v557_v55 = vmax.f32 %v541_v51, %v571_v53  ;;  %v1305_v53 = vmov 7  }
  0xa4   :  { %v577_v56 = vpop.permute.xlu1 %576 }
  0xa5   :  { %vm581_vm7 = vcmp.eq.s32.totalorder %v577_v56, 1  ;;  %v1307_v56 = vmov 8  }
  0xa6   :  { %v587_v57 = vsel %vm581_vm7, %v1475_v54, -3e+38 }
  0xa7   :  { %v573_v58 = vmax.f32 %v557_v55, %v587_v57  ;;  %v1306_v55 = vmov 10   ;;  %v521_v57 = vsub.s32 0, %v1439_v37 }
  0xd7   :  { %v1142_v21 = vpop.f32.mrb[0].mxu0 }
  0xd8   :  { %v138_v22 = vadd.f32 %v1142_v21, %v1089_v20  ;;  %v132_v23 = vpop.f32.mrb[1].mxu0 }
  0xd9   :  { %v133_v24 = vadd.f32 %v1089_v20, %v132_v23 }
  0xda   :  { %v152_v27 = vmax.f32 %v138_v22, 0.0 }
  0xdb   :  { %v151_v25 = vmax.f32 %v133_v24, 0.0  ;;  %v1145_v26 = vpop.f32.mrb[2].mxu0 }
  0xdc   :  { %v148_v28 = vadd.f32 %v1145_v26, %v1089_v20  ;;  %v142_v29 = vpop.f32.mrb[3].mxu0 }
  0xdd   :  { %v143_v30 = vadd.f32 %v1089_v20, %v142_v29  ;;  %1154 = vmatprep.mubr.msk.f32.mxu1 %vm166_vm3, %v151_v25  ;;  %v1514_v25 = vrot.slane %v1448_v41, %v601_v12 }
  0xde   :  { %v154_v31 = vmax.f32 %v148_v28, 0.0  ;;  %1155 = vmatmul.mubr.msk.f32.vlgmr.msra.gmra.mrb[0].mxu1 %vm166_vm3, %v152_v27 }
  0xdf   :  { %v153_v32 = vmax.f32 %v143_v30, 0.0 }
  0xe1   :  { %1157 = vmatprep.mubr.msk.f32.mxu1 %vm166_vm3, %v153_v32 }
  0xe2   :  { %1158 = vmatmul.mubr.msk.f32.gmra.mrb[2].mxu1 %vm166_vm3, %v154_v31 }
 0x1b1   :  { %v1156_v60 = vpop.f32.mrb[0].mxu1 }
 0x1b2   :  { %v1481_v61 = vadd.f32 %v1156_v60, %v1094_v59  ;;  %v245_v62 = vpop.f32.mrb[1].mxu1 }
 0x1b3   :  { %v1483_v63 = vadd.f32 %v1094_v59, %v245_v62  ;;  %v540_v62 = vsel %vm534_vm15, %v1458_v44, -3e+38  ;;  %v572_v44 = vsel %vm566_vm2, %v1468_v49, -3e+38 }
 0x1b4   :  { %v270_v0 = vsel %vm266_vm8, %v1481_v61, inf }
 0x1b5   :  { %271 = vmin.xlane.f32.xlu1 %v270_v0  ;;  %v1159_v1 = vpop.f32.mrb[2].mxu1  ;;  %v267_v6 = vsel %vm266_vm8, %v1483_v63, inf }
 0x1b6   :  { %v1487_v2 = vadd.f32 %v1159_v1, %v1094_v59  ;;  %v255_v3 = vpop.f32.mrb[3].mxu1 }
 0x1b7   :  { %v1489_v4 = vadd.f32 %v1094_v59, %v255_v3  ;;  %v556_v3 = vsel %vm550_vm1, %v1453_v43, -3e+38 }
 0x1b8   :  { %v276_v5 = vsel %vm266_vm8, %v1487_v2, inf }
 0x1b9   :  { %277 = vmin.xlane.f32.xlu0 %v276_v5  ;;  %268 = vmin.xlane.f32.xlu1 %v267_v6  ;;  %v273_v7 = vsel %vm266_vm8, %v1489_v4, inf }
 0x1bd   :  { %274 = vmin.xlane.f32.xlu0 %v273_v7 }
 0x1ca   :  { %592 = vperm.xlu1 %1231, %v1424_v16  }
 0x1d3   :  { %579 = vperm.xlu0 %1230, %v1419_v15  }
 0x1d7   :  { %1236 = vset.pattern.permute.xlu0 %v1306_v55 }
 0x242   :  { %v272_v10 = vpop.xlane.xlu1 %271 }
 0x243   :  { %vm280_vm9 = vcmp.eq.f32.partialorder %v1481_v61, %v272_v10 }
 0x244   :  { %v284_v11 = vsel %vm280_vm9, %v1499_v8, 4294967295 }
 0x245   :  { %v302_v14 = vsel %vm266_vm8, %v284_v11, 2147483648 }
 0x246   :  { %v278_v18 = vpop.xlane.xlu0 %277  ;;  %v269_v20 = vpop.xlane.xlu1 %268  ;;  %v304_v21 = vshra.s32 %v302_v14, 16  ;;  %v303_v0 = vand.u32 65535, %v302_v14 }
 0x247   :  { %vm282_vm10 = vcmp.eq.f32.partialorder %v1487_v2, %v278_v18  ;;  %vm279_vm11 = vcmp.eq.f32.partialorder %v1483_v63, %v269_v20 }
 0x248   :  { %v286_v22 = vsel %vm282_vm10, %v1499_v8, 4294967295  ;;  %v283_v23 = vsel %vm279_vm11, %v1499_v8, 4294967295  ;;  %v306_v24 = vcvt.s32.f32 %v304_v21  ;;  %v305_v7 = vcvt.s32.f32 %v303_v0 }
 0x249   :  { %v332_v26 = vsel %vm266_vm8, %v286_v22, 2147483648  ;;  %v287_v27 = vsel %vm266_vm8, %v283_v23, 2147483648  ;;  %v617_v22 = vsub.s32 6, %v1439_v37 }
 0x24a   :  { %v275_v28 = vpop.xlane.xlu0 %274  ;;  %307 = vmax.xlane.f32.xlu1 %v306_v24  ;;  %v334_v29 = vshra.s32 %v332_v26, 16  ;;  %v289_v30 = vshra.s32 %v287_v27, 16  ;;  %v593_v31 = vpop.permute.xlu1 %592  ;;  %v288_v10 = vand.u32 65535, %v287_v27  ;;  %v333_v11 = vand.u32 65535, %v332_v26 }
 0x24b   :  { %vm281_vm12 = vcmp.eq.f32.partialorder %v1489_v4, %v275_v28  ;;  %vm597_vm13 = vcmp.eq.s32.totalorder %v593_v31, 1  ;;  %v618_v27 = vrot.slane %v1448_v41, %v617_v22  ;;  %v633_v31 = vsub.s32 7, %v1439_v37 }
 0x24c   :  { %v285_v32 = vsel %vm281_vm12, %v1499_v8, 4294967295  ;;  %v336_v33 = vcvt.s32.f32 %v334_v29  ;;  %v291_v35 = vcvt.s32.f32 %v289_v30  ;;  %v603_v36 = vsel %vm597_vm13, %v1514_v25, -3e+38 }
 0x24d   :  { %v1522_v42 = vsel %vm266_vm8, %v285_v32, 2147483648  ;;  %v1524_v46 = vmax.f32 %v573_v58, %v603_v36  ;;  %v1540_v58 = vrot.slane %v1448_v41, %v521_v57  ;;  %v290_v43 = vcvt.s32.f32 %v288_v10 }
 0x24e   :  { %337 = vmax.xlane.f32.xlu1 %v336_v33  ;;  %292 = vmax.xlane.f32.xlu0 %v291_v35  ;;  %v319_v47 = vshra.s32 %v1522_v42, 16  ;;  %v335_v18 = vcvt.s32.f32 %v333_v11  ;;  %v405_v11 = vld [vmem:[%s1839_s2 + $0x10] sm:$0xff] }
 0x24f   :  { %v524_v59 = vsel %vm518_vm14, %v1540_v58, -3e+38  ;;  %vm407_vm14 = vcmask 130048  }
 0x250   :  { %v1527_v51 = vcvt.s32.f32 %v319_v47  ;;  %v526_v60 = vmax.f32 %v524_v59, -3e+38  ;;  %v1308_v59 = vmov 9  }
 0x252   :  { %322 = vmax.xlane.f32.xlu0 %v1527_v51  ;;  %v542_v1 = vmax.f32 %v526_v60, %v540_v62  ;;  %v580_v5 = vpop.permute.xlu0 %579  ;;  %v1309_v60 = vmov 11   ;;  %v1310_v62 = vmov 12  }
 0x253   :  { %vm582_vm4 = vcmp.eq.s32.totalorder %v580_v5, 1 }
 0x254   :  { %v558_v38 = vmax.f32 %v542_v1, %v556_v3  ;;  %v588_v9 = vsel %vm582_vm4, %v1475_v54, -3e+38  ;;  %v318_v1 = vand.u32 65535, %v1522_v42  ;;  %v403_v42 = vld [vmem:[%s1839_s2] sm:$0xff] }
 0x255   :  { %1164 = vmatprep.mubr.msk.f32.mxu0 %vm407_vm14, %v403_v42 }
 0x256   :  { %v574_v23 = vmax.f32 %v558_v38, %v572_v44  ;;  %v320_v3 = vcvt.s32.f32 %v318_v1 }
 0x25f   :  { %595 = vperm.xlu1 %1231, %v1419_v15  }
 0x263   :  { %1232 = vset.pattern.permute.xlu1 %v1304_v52 }
 0x264   :  { %608 = vperm.xlu1 %1232, %v1424_v16  }
 0x268   :  { %611 = vperm.xlu1 %1232, %v1419_v15  }
 0x26c   :  { %1233 = vset.pattern.permute.xlu1 %v1305_v53 }
 0x26d   :  { %624 = vperm.xlu1 %1233, %v1424_v16  }
 0x271   :  { %627 = vperm.xlu1 %1233, %v1419_v15  }
 0x275   :  { %1234 = vset.pattern.permute.xlu1 %v1307_v56 }
 0x2d7   :  { %v1548_v6 = vpop.xlane.xlu1 %307 }
 0x2d8   :  { %vm309_vm3 = vcmp.eq.f32.partialorder %v306_v24, %v1548_v6  ;;  %v590_v24 = vmax.f32 %v574_v23, %v588_v9 }
 0x2d9   :  { %v310_v34 = vsel %vm309_vm3, %v305_v7, -inf  ;;  %v1593_v7 = vld [vmem:[%s1838_s1 + $0x8] sm:$0xff] }
 0x2da   :  { %311 = vmax.xlane.f32.xlu1 %v310_v34  ;;  %v1190_v10 = vpack.c.bf16 %v1593_v7, %v1448_v41  ;;  %v314_v34 = vcvt.f32.s32 %v1548_v6 }
 0x2db   :  { %v1553_v48 = vpop.xlane.xlu0 %292  ;;  %v1555_v14 = vpop.xlane.xlu1 %337 }
 0x2dc   :  { %vm294_vm5 = vcmp.eq.f32.partialorder %v291_v35, %v1553_v48  ;;  %vm339_vm6 = vcmp.eq.f32.partialorder %v336_v33, %v1555_v14  ;;  %1191 = vmatprep.subr.bf16.mxu0 %v1190_v10  ;;  %v299_v38 = vcvt.f32.s32 %v1553_v48  ;;  %v650_v48 = vrot.slane %v1593_v7, %v521_v57 }
 0x2dd   :  { %v295_v20 = vsel %vm294_vm5, %v290_v43, -inf  ;;  %v340_v21 = vsel %vm339_vm6, %v335_v18, -inf  ;;  %1193 = vmatpush3.bf16.msra.mxu0 %v1190_v10  ;;  %v315_v43 = vshll.u32 %v314_v34, 16  ;;  %v344_v18 = vcvt.f32.s32 %v1555_v14 }
 0x2de   :  { %296 = vmax.xlane.f32.xlu0 %v295_v20  ;;  %341 = vmax.xlane.f32.xlu1 %v340_v21  ;;  %v300_v21 = vshll.u32 %v299_v38, 16 }
 0x2df   :  { %v596_v49 = vpop.permute.xlu1 %595  ;;  %v1583_v0 = vpop.xlane.xlu0 %322 }
 0x2e0   :  { %vm598_vm7 = vcmp.eq.s32.totalorder %v596_v49, 1  ;;  %vm324_vm13 = vcmp.eq.f32.partialorder %v1527_v51, %v1583_v0  ;;  %v404_v51 = vld [vmem:[%s1839_s2 + $0x8] sm:$0xff] }
 0x2e1   :  { %v604_v26 = vsel %vm598_vm7, %v1514_v25, -3e+38  ;;  %v634_v25 = vrot.slane %v1448_v41, %v633_v31  ;;  %v325_v5 = vsel %vm324_vm13, %v320_v3, -inf  ;;  %1165 = vmatmul.mubr.msk.f32.vlgmr.msra.gmra.mrb[4].mxu0 %vm407_vm14, %v404_v51  ;;  %v406_v41 = vld [vmem:[%s1839_s2 + $0x18] sm:$0xff]  ;;  %v698_v51 = vrot.slane %v1593_v7, %v569_v45 }
 0x2e2   :  { %v606_v28 = vmax.f32 %v590_v24, %v604_v26  ;;  %1167 = vmatprep.mubr.msk.f32.mxu0 %vm407_vm14, %v405_v11  ;;  %v345_v24 = vshll.u32 %v344_v18, 16 }
 0x2e3   :  { %v609_v29 = vpop.permute.xlu1 %608 }
 0x2e4   :  { %vm613_vm9 = vcmp.eq.s32.totalorder %v609_v29, 1 }
 0x2e5   :  { %v619_v54 = vsel %vm613_vm9, %v618_v27, -3e+38  ;;  %1168 = vmatmul.mubr.msk.f32.gmra.mrb[6].mxu0 %vm407_vm14, %v406_v41  ;;  %v714_v41 = vrot.slane %v1593_v7, %v585_v50  ;;  %v329_v50 = vcvt.f32.s32 %v1583_v0 }
 0x2e6   :  { %v605_v30 = vmax.f32 %v1524_v46, %v619_v54 }
 0x2e7   :  { %v612_v32 = vpop.permute.xlu1 %611  ;;  %v330_v18 = vshll.u32 %v329_v50, 16 }
 0x2e8   :  { %vm614_vm10 = vcmp.eq.s32.totalorder %v612_v32, 1 }
 0x2e9   :  { %v620_v33 = vsel %vm614_vm10, %v618_v27, -3e+38 }
 0x2ea   :  { %v622_v35 = vmax.f32 %v606_v28, %v620_v33 }
 0x2ec   :  { %v625_v36 = vpop.permute.xlu1 %624 }
 0x2ed   :  { %vm629_vm11 = vcmp.eq.s32.totalorder %v625_v36, 1 }
 0x2ee   :  { %v635_v47 = vsel %vm629_vm11, %v634_v25, -3e+38 }
 0x2ef   :  { %v1570_v52 = vmax.f32 %v605_v30, %v635_v47  ;;  %640 = vperm.xlu1 %1234, %v1424_v16   ;;  %v682_v30 = vrot.slane %v1593_v7, %v553_v39 }
 0x2f0   :  { %v628_v53 = vpop.permute.xlu1 %627 }
 0x2f1   :  { %vm630_vm12 = vcmp.eq.s32.totalorder %v628_v53, 1 }
 0x2f2   :  { %v636_v46 = vsel %vm630_vm12, %v634_v25, -3e+38 }
 0x2f3   :  { %v1573_v56 = vmax.f32 %v622_v35, %v636_v46  ;;  %643 = vperm.xlu1 %1234, %v1419_v15  }
 0x2f4   :  { %672 = vperm.xlu0 %1236, %v1424_v16  }
 0x2f7   :  { %1235 = vset.pattern.permute.xlu1 %v1308_v59 }
 0x2f8   :  { %656 = vperm.xlu1 %1235, %v1424_v16   ;;  %1239 = vset.pattern.permute.xlu0 %v1309_v60 }
 0x2fc   :  { %659 = vperm.xlu1 %1235, %v1419_v15  }
 0x300   :  { %1237 = vset.pattern.permute.xlu1 %v1306_v55  ;;  %v1311_v55 = vmov 13  }
 0x301   :  { %675 = vperm.xlu1 %1237, %v1419_v15  }
 0x305   :  { %1238 = vset.pattern.permute.xlu1 %v1309_v60 }
 0x306   :  { %688 = vperm.xlu1 %1238, %v1424_v16  }
 0x30a   :  { %1240 = vset.pattern.permute.xlu1 %v1310_v62 }
 0x30b   :  { %704 = vperm.xlu1 %1240, %v1424_v16  }
 0x313   :  { %326 = vmax.xlane.f32.xlu0 %v325_v5 }
 0x329   :  { %691 = vperm.xlu0 %1239, %v1419_v15  }
 0x32d   :  { %1241 = vset.pattern.permute.xlu0 %v1311_v55 }
 0x367   :  { %v312_v44 = vpop.xlane.xlu1 %311 }
 0x368   :  { %v313_v9 = vcvt.f32.s32 %v312_v44  ;;  %v1312_v44 = vmov 14  }
 0x36a   :  { %v1616_v20 = vadd.s32 %v315_v43, %v313_v9  ;;  %v1313_v43 = vmov 15  }
 0x36b   :  { %v297_v23 = vpop.xlane.xlu0 %296  ;;  %v342_v49 = vpop.xlane.xlu1 %341 }
 0x36c   :  { %v298_v26 = vcvt.f32.s32 %v297_v23  ;;  %v343_v27 = vcvt.f32.s32 %v342_v49  ;;  %vm348_vm15 = vcmp.ne.s32.totalorder %v1499_v8, %v1616_v20  ;;  %v768_v20 = vld [vmem:[%s1841_s4 + $0x8] sm:$0xff] }
 0x36d   :  { %v1624_v6 = vsel %vm348_vm15, %v1481_v61, -inf }
 0x36e   :  { %v1629_v14 = vadd.s32 %v300_v21, %v298_v26  ;;  %v1631_v28 = vadd.s32 %v345_v24, %v343_v27  ;;  %v358_v29 = vsel %vm266_vm8, %v1624_v6, -inf }
 0x36f   :  { %359 = vmax.xlane.f32.xlu1 %v358_v29  ;;  %v641_v54 = vpop.permute.xlu1 %640 }
 0x370   :  { %vm645_vm1 = vcmp.eq.s32.totalorder %v641_v54, 1  ;;  %vm347_vm2 = vcmp.ne.s32.totalorder %v1499_v8, %v1629_v14  ;;  %vm350_vm3 = vcmp.ne.s32.totalorder %v1499_v8, %v1631_v28 }
 0x371   :  { %v651_v61 = vsel %vm645_vm1, %v650_v48, -3e+38  ;;  %v1643_v57 = vsel %vm347_vm2, %v1483_v63, -inf  ;;  %v1652_v32 = vsel %vm350_vm3, %v1487_v2, -inf  ;;  %v666_v2 = vrot.slane %v1593_v7, %v537_v40 }
 0x372   :  { %v637_v33 = vmax.f32 %v1570_v52, %v651_v61  ;;  %v355_v35 = vsel %vm266_vm8, %v1643_v57, -inf  ;;  %v364_v25 = vsel %vm266_vm8, %v1652_v32, -inf }
 0x373   :  { %356 = vmax.xlane.f32.xlu0 %v355_v35  ;;  %v673_v63 = vpop.permute.xlu0 %672  ;;  %365 = vmax.xlane.f32.xlu1 %v364_v25  ;;  %v644_v36 = vpop.permute.xlu1 %643 }
 0x374   :  { %vm677_vm4 = vcmp.eq.s32.totalorder %v673_v63, 1  ;;  %vm646_vm5 = vcmp.eq.s32.totalorder %v644_v36, 1 }
 0x375   :  { %v683_v39 = vsel %vm677_vm4, %v682_v30, -3e+38  ;;  %v652_v47 = vsel %vm646_vm5, %v650_v48, -3e+38 }
 0x376   :  { %v653_v53 = vmax.f32 %v637_v33, %v683_v39  ;;  %v654_v52 = vmax.f32 %v1573_v56, %v652_v47 }
 0x377   :  { %v657_v46 = vpop.permute.xlu1 %656 }
 0x378   :  { %vm661_vm6 = vcmp.eq.s32.totalorder %v657_v46, 1 }
 0x379   :  { %v667_v59 = vsel %vm661_vm6, %v666_v2, -3e+38 }
 0x37a   :  { %v669_v60 = vmax.f32 %v653_v53, %v667_v59 }
 0x37b   :  { %v660_v62 = vpop.permute.xlu1 %659 }
 0x37c   :  { %vm662_vm7 = vcmp.eq.s32.totalorder %v660_v62, 1 }
 0x37d   :  { %v668_v1 = vsel %vm662_vm7, %v666_v2, -3e+38  ;;  %v767_v2 = vld [vmem:[%s1841_s4] sm:$0xff]  ;;  %s1314_s4 = smov 120  }
 0x37e   :  { %v670_v3 = vmax.f32 %v654_v52, %v668_v1  ;;  %vm769_vm6 = vcmp.gt.f32.partialorder %v767_v2, 0.0 }
 0x380   :  { %v676_v5 = vpop.permute.xlu1 %675 }
 0x381   :  { %vm678_vm9 = vcmp.eq.s32.totalorder %v676_v5, 1 }
 0x382   :  { %v684_v10 = vsel %vm678_vm9, %v682_v30, -3e+38  ;;  %v730_v30 = vrot.slane %v1593_v7, %v601_v12 }
 0x383   :  { %v686_v42 = vmax.f32 %v670_v3, %v684_v10 }
 0x384   :  { %707 = vperm.xlu1 %1240, %v1419_v15  }
 0x385   :  { %v689_v40 = vpop.permute.xlu1 %688 }
 0x386   :  { %vm693_vm10 = vcmp.eq.s32.totalorder %v689_v40, 1 }
 0x387   :  { %v699_v56 = vsel %vm693_vm10, %v698_v51, -3e+38 }
 0x388   :  { %1242 = vset.pattern.permute.xlu1 %v1311_v55  ;;  %v685_v11 = vmax.f32 %v669_v60, %v699_v56 }
 0x389   :  { %723 = vperm.xlu1 %1242, %v1419_v15  }
 0x38a   :  { %v705_v34 = vpop.permute.xlu1 %704 }
 0x38b   :  { %vm709_vm11 = vcmp.eq.s32.totalorder %v705_v34, 1 }
 0x38c   :  { %v715_v38 = vsel %vm709_vm11, %v714_v41, -3e+38 }
 0x38d   :  { %1243 = vset.pattern.permute.xlu1 %v1312_v44  ;;  %v701_v45 = vmax.f32 %v685_v11, %v715_v38 }
 0x38e   :  { %736 = vperm.xlu1 %1243, %v1424_v16  }
 0x392   :  { %1246 = vset.pattern.permute.xlu1 %v1313_v43 }
 0x393   :  { %752 = vperm.xlu1 %1246, %v1424_v16  }
 0x397   :  { %755 = vperm.xlu1 %1246, %v1419_v15  }
 0x39b   :  { %1247 = vset.pattern.permute.xlu1 %v1298_v13 }
 0x3a0   :  { %v327_v55 = vpop.xlane.xlu0 %326 }
 0x3a1   :  { %v328_v9 = vcvt.f32.s32 %v327_v55 }
 0x3a3   :  { %v1677_v21 = vadd.s32 %v330_v18, %v328_v9 }
 0x3a5   :  { %vm349_vm12 = vcmp.ne.s32.totalorder %v1499_v8, %v1677_v21 }
 0x3a6   :  { %v353_v23 = vsel %vm349_vm12, %v1489_v4, -inf }
 0x3a7   :  { %v361_v49 = vsel %vm266_vm8, %v353_v23, -inf }
 0x3a8   :  { %362 = vmax.xlane.f32.xlu0 %v361_v49  ;;  %v692_v24 = vpop.permute.xlu0 %691 }
 0x3a9   :  { %vm694_vm13 = vcmp.eq.s32.totalorder %v692_v24, 1 }
 0x3aa   :  { %v700_v26 = vsel %vm694_vm13, %v698_v51, -3e+38  ;;  %vm1058_vm13 = vcmp.eq.f32.partialorder %v1593_v7, 0.0 }
 0x3ab   :  { %v702_v0 = vmax.f32 %v686_v42, %v700_v26 }
 0x3b4   :  { %v1710_v46 = vpop.f32.mrb[4].mxu0 }
 0x3b5   :  { %v1712_v59 = vpop.f32.mrb[5].mxu0 }
 0x3b8   :  { %v1714_v62 = vpop.f32.mrb[6].mxu0 }
 0x3b9   :  { %v1716_v3 = vpop.f32.mrb[7].mxu0 }
 0x3be   :  { %720 = vperm.xlu0 %1241, %v1424_v16  }
 0x3c2   :  { %1244 = vset.pattern.permute.xlu0 %v1312_v44 }
 0x3c3   :  { %739 = vperm.xlu0 %1244, %v1419_v15  }
 0x3c7   :  { %1245 = vset.pattern.permute.xlu0 %v1298_v13 }
 0x3c8   :  { %512 = vperm.xlu0 %1245, %v1424_v16   ;;  %v746_v16 = vrot.slane %v1593_v7, %v617_v22  ;;  %v771_v22 = vsel %vm769_vm6, 1, %v1298_v13 }
 0x3fc   :  { %v360_v27 = vpop.xlane.xlu1 %359 }
 0x3fd   :  { %v368_v53 = vsub.f32 %v1624_v6, %v360_v27  ;;  %v762_v6 = vrot.slane %v1593_v7, %v633_v31 }
 0x3ff   :  { %v373_v28 = vmul.f32 1.442695, %v368_v53  ;;  %v946_v53 = vld [vmem:[%s1846_s9] sm:$0xff] }
 0x400   :  { %v366_v48 = vpop.xlane.xlu1 %365  ;;  %v357_v52 = vpop.xlane.xlu0 %356 }
 0x401   :  { %v370_v4 = vsub.f32 %v1652_v32, %v366_v48 }
 0x403   :  { %v377_v29 = vmul.f32 1.442695, %v370_v4 }
 0x404   :  { %v708_v54 = vpop.permute.xlu1 %707 }
 0x405   :  { %vm710_vm1 = vcmp.eq.s32.totalorder %v708_v54, 1  ;;  %1257 = vpow2.f32 %v377_v29 }
 0x406   :  { %v716_v61 = vsel %vm710_vm1, %v714_v41, -3e+38  ;;  %1259 = vpow2.f32 %v373_v28 }
 0x407   :  { %v718_v33 = vmax.f32 %v702_v0, %v716_v61  ;;  %v367_v0 = vsub.f32 %v1643_v57, %v357_v52  ;;  %v947_v52 = vld [vmem:[%s1846_s9 + $0x8] sm:$0xff] }
 0x408   :  { %v724_v35 = vpop.permute.xlu1 %723  ;;  %v1194_v28 = vpack.c.bf16 %v947_v52, %v946_v53 }
 0x409   :  { %vm726_vm4 = vcmp.eq.s32.totalorder %v724_v35, 1  ;;  %v371_v27 = vmul.f32 1.442695, %v367_v0 }
 0x40a   :  { %v732_v15 = vsel %vm726_vm4, %v730_v30, -3e+38  ;;  %1198 = vmatprep.subr.bf16.mxu1 %v1194_v28  ;;  %1195 = vmatprep.subr.bf16.mxu0 %v1194_v28 }
 0x40b   :  { %v734_v25 = vmax.f32 %v718_v33, %v732_v15  ;;  %1200 = vmatpush3.bf16.msra.mxu1 %v1194_v28  ;;  %1197 = vmatpush3.bf16.msra.mxu0 %v1194_v28 }
 0x40d   :  { %v737_v63 = vpop.permute.xlu1 %736 }
 0x40e   :  { %vm741_vm5 = vcmp.eq.s32.totalorder %v737_v63, 1 }
 0x40f   :  { %v747_v32 = vsel %vm741_vm5, %v746_v16, -3e+38  ;;  %v1258_v36 = vpop.eup %1257 }
 0x410   :  { %v717_v39 = vmax.f32 %v701_v45, %v747_v32  ;;  %v1700_v47 = vsel %vm350_vm3, %v1258_v36, 0.0  ;;  %v1260_v41 = vpop.eup %1259 }
 0x411   :  { %v392_v12 = vsel %vm266_vm8, %v1700_v47, 0.0  ;;  %v380_v37 = vsel %vm348_vm15, %v1260_v41, 0.0  ;;  %vm770_vm15 = vcmp.gt.f32.partialorder %v768_v20, 0.0 }
 0x412   :  { %393 = vadd.xlane.f32.xlu0 %v392_v12  ;;  %v753_v10 = vpop.permute.xlu1 %752  ;;  %v772_v21 = vsel %vm770_vm15, 1, %v1298_v13 }
 0x413   :  { %vm757_vm3 = vcmp.eq.s32.totalorder %v753_v10, 1 }
 0x414   :  { %v763_v56 = vsel %vm757_vm3, %v762_v6, -3e+38 }
 0x416   :  { %v756_v51 = vpop.permute.xlu1 %755 }
 0x417   :  { %vm758_vm9 = vcmp.eq.s32.totalorder %v756_v51, 1  ;;  %v1103_v51 = vld [vmem:[%s1847_s10] ss:$0 sm:$0xff] }
 0x418   :  { %v764_v43 = vsel %vm758_vm9, %v762_v6, -3e+38 }
 0x428   :  { %774 = vperm.xlu0 %1245, %v771_v22  }
 0x42c   :  { %1248 = vset.pattern.permute.xlu0 %v1300_v17 }
 0x435   :  { %v363_v60 = vpop.xlane.xlu0 %362 }
 0x436   :  { %v369_v1 = vsub.f32 %v353_v23, %v363_v60  ;;  %v386_v23 = vsel %vm266_vm8, %v380_v37, 0.0 }
 0x438   :  { %v375_v5 = vmul.f32 1.442695, %v369_v1 }
 0x43a   :  { %1261 = vpow2.f32 %v375_v5 }
 0x43b   :  { %1263 = vpow2.f32 %v371_v27 }
 0x43d   :  { %v721_v42 = vpop.permute.xlu0 %720 }
 0x43e   :  { %vm725_vm7 = vcmp.eq.s32.totalorder %v721_v42, 1 }
 0x43f   :  { %v731_v40 = vsel %vm725_vm7, %v730_v30, -3e+38 }
 0x440   :  { %v733_v11 = vmax.f32 %v717_v39, %v731_v40 }
 0x442   :  { %v749_v34 = vmax.f32 %v733_v11, %v763_v56  ;;  %v740_v38 = vpop.permute.xlu0 %739  ;;  %v1104_v56 = vld [vmem:[%s1847_s10 + $0x1] ss:$0 sm:$0xff] }
 0x443   :  { %vm742_vm10 = vcmp.eq.s32.totalorder %v740_v38, 1 }
 0x444   :  { %v1262_v44 = vpop.eup %1261  ;;  %v748_v45 = vsel %vm742_vm10, %v746_v16, -3e+38 }
 0x445   :  { %v750_v31 = vmax.f32 %v734_v25, %v748_v45  ;;  %v381_v50 = vsel %vm349_vm12, %v1262_v44, 0.0  ;;  %v1264_v48 = vpop.eup %1263  ;;  %v1105_v44 = vld [vmem:[%s1847_s10 + $0x2] ss:$0 sm:$0xff]  ;;  %vm949_vm12 = vcmask 195584  }
 0x446   :  { %v389_v55 = vsel %vm266_vm8, %v381_v50, 0.0 }
 0x447   :  { %v766_v18 = vmax.f32 %v750_v31, %v764_v43  ;;  %v513_v9 = vpop.permute.xlu0 %512  ;;  %390 = vadd.xlane.f32.xlu1 %v389_v55  ;;  %387 = vadd.xlane.f32.xlu0 %v386_v23 }
 0x448   :  { %vm517_vm11 = vcmp.eq.s32.totalorder %v513_v9, 1 }
 0x449   :  { %v523_v49 = vsel %vm517_vm11, %v1540_v58, -3e+38  ;;  %v379_v58 = vsel %vm347_vm2, %v1264_v48, 0.0 }
 0x44a   :  { %v525_v24 = vmax.f32 %v523_v49, -3e+38  ;;  %v383_v4 = vsel %vm266_vm8, %v379_v58, 0.0 }
 0x44c   :  { %v765_v26 = vmax.f32 %v749_v34, %v525_v24 }
 0x458   :  { %777 = vperm.xlu1 %1247, %v772_v21  }
 0x45c   :  { %1249 = vset.pattern.permute.xlu1 %v1300_v17 }
 0x47c   :  { %384 = vadd.xlane.f32.xlu1 %v383_v4 }
 0x49f   :  { %v394_v29 = vpop.xlane.xlu0 %393 }
 0x4a0   :  { %1265 = vrcp.f32 %v394_v29 }
 0x4a7   :  { %v775_v8 = vpop.permute.xlu0 %774 }
 0x4a8   :  { %vm779_vm8 = vcmp.eq.s32.totalorder %v775_v8, 1 }
 0x4a9   :  { %v1748_v16 = vsel %vm779_vm8, %v765_v26, 0.0 }
 0x4aa   :  { %v1266_v54 = vpop.eup %1265 }
 0x4ab   :  { %v402_v61 = vmul.f32 %v1266_v54, %v1700_v47 }
 0x4ad   :  { %844 = vperm.xlu1 %1249, %v402_v61  }
 0x4b1   :  { %1250 = vset.pattern.permute.xlu1 %v1302_v19 }
 0x4b2   :  { %864 = vperm.xlu1 %1250, %v402_v61  }
 0x4b6   :  { %793 = vrot.lane.b32.xlu1 %v1716_v3, %s1314_s4 }
 0x4ba   :  { %795 = vrot.lane.b32.xlu1 %v1714_v62, %s1314_s4 }
 0x4d4   :  { %v391_v14 = vpop.xlane.xlu1 %390  ;;  %v388_v57 = vpop.xlane.xlu0 %387 }
 0x4d5   :  { %1267 = vrcp.f32 %v391_v14 }
 0x4d6   :  { %1269 = vrcp.f32 %v388_v57 }
 0x4d8   :  { %v778_v15 = vpop.permute.xlu1 %777 }
 0x4d9   :  { %vm780_vm2 = vcmp.eq.s32.totalorder %v778_v15, 1 }
 0x4da   :  { %v1754_v63 = vsel %vm780_vm2, %v766_v18, 0.0 }
 0x4df   :  { %v1268_v30 = vpop.eup %1267 }
 0x4e0   :  { %v400_v33 = vmul.f32 %v1268_v30, %v381_v50  ;;  %v1270_v35 = vpop.eup %1269 }
 0x4e1   :  { %v1746_v25 = vmul.f32 %v1270_v35, %v380_v37 }
 0x4e2   :  { %860 = vperm.xlu1 %1250, %v400_v33   ;;  %840 = vperm.xlu0 %1248, %v400_v33  }
 0x4e6   :  { %801 = vrot.lane.b32.xlu1 %v1748_v16, %s1314_s4  ;;  %836 = vperm.xlu0 %1248, %v1746_v25  }
 0x4e7   :  { %1251 = vset.pattern.permute.xlu1 %v1300_v17 }
 0x4ea   :  { %1254 = vset.pattern.permute.xlu0 %v1298_v13  ;;  %803 = vrot.lane.b32.xlu1 %v1754_v63, %s1314_s4 }
 0x4eb   :  { %819 = vperm.xlu0 %1254, %v400_v33  }
 0x4ef   :  { %785 = vrot.lane.b32.xlu0 %v1712_v59, %s1314_s4 }
 0x509   :  { %v385_v32 = vpop.xlane.xlu1 %384 }
 0x50a   :  { %1271 = vrcp.f32 %v385_v32 }
 0x514   :  { %v1272_v36 = vpop.eup %1271 }
 0x515   :  { %v396_v39 = vmul.f32 %v1272_v36, %v379_v58 }
 0x517   :  { %832 = vperm.xlu1 %1251, %v396_v39  }
 0x51b   :  { %1252 = vset.pattern.permute.xlu1 %v1298_v13 }
 0x51c   :  { %824 = vperm.xlu1 %1252, %v402_v61  }
 0x520   :  { %1253 = vset.pattern.permute.xlu1 %v1302_v19 }
 0x521   :  { %852 = vperm.xlu1 %1253, %v396_v39  }
 0x525   :  { %856 = vperm.xlu1 %1253, %v1746_v25  }
 0x529   :  { %787 = vrot.lane.b32.xlu1 %v1710_v46, %s1314_s4 }
 0x52a   :  { %1255 = vset.pattern.permute.xlu1 %v1298_v13  ;;  %v948_v13 = vld [vmem:[%s1846_s9 + $0x10] sm:$0xff] }
 0x52b   :  { %1199 = vmatprep.subr.mxu1 %v948_v13  ;;  %1174 = vmatprep.subr.mxu0 %v948_v13 }
 0x52c   :  { %v845_v17 = vpop.permute.xlu1 %844  ;;  %1201 = vmatpush3.msra.mxu1 %v948_v13  ;;  %1175 = vmatpush3.msra.mxu0 %v948_v13 }
 0x52d   :  { %v928_v9 = vmul.f32 %v1104_v56, %v845_v17 }
 0x531   :  { %v865_v47 = vpop.permute.xlu1 %864 }
 0x532   :  { %v941_v49 = vmul.f32 %v1105_v44, %v865_v47 }
 0x535   :  { %v794_v12 = vpop.permute.xlu1 %793 }
 0x539   :  { %v796_v2 = vpop.permute.xlu1 %795 }
 0x53a   :  { %v850_v22 = vmul.f32 %v845_v17, %v796_v2 }
 0x53c   :  { %881 = vrot.lane.b32.xlu1 %v850_v22, %s1315_s13 }
 0x561   :  { %v841_v60 = vpop.permute.xlu0 %840  ;;  %v861_v1 = vpop.permute.xlu1 %860 }
 0x562   :  { %v849_v5 = vmul.f32 %v841_v60, %v794_v12  ;;  %v927_v34 = vmul.f32 %v1104_v56, %v841_v60  ;;  %v940_v45 = vmul.f32 %v1105_v44, %v861_v1 }
 0x564   :  { %879 = vrot.lane.b32.xlu0 %v849_v5, %s1315_s13 }
 0x565   :  { %v837_v10 = vpop.permute.xlu0 %836  ;;  %v802_v6 = vpop.permute.xlu1 %801 }
 0x566   :  { %v869_v42 = vmul.f32 %v861_v1, %v802_v6  ;;  %v848_v37 = vmul.f32 %v1714_v62, %v837_v10 }
 0x568   :  { %895 = vrot.lane.b32.xlu0 %v869_v42, %s1316_s7 }
 0x569   :  { %v804_v40 = vpop.permute.xlu1 %803 }
 0x56a   :  { %v870_v11 = vmul.f32 %v865_v47, %v804_v40  ;;  %v820_v41 = vpop.permute.xlu0 %819 }
 0x56b   :  { %v918_v38 = vmul.f32 %v1103_v51, %v820_v41 }
 0x56c   :  { %809 = vperm.xlu0 %1254, %v396_v39   ;;  %897 = vrot.lane.b32.xlu1 %v870_v11, %s1316_s7  ;;  %v1273_v11 = vld [vmem:[%s1838_s1] sm:$0xff]  ;;  %s1274_s1 = scalar_lea.vmem %s1079_s23, 256 }
 0x56d   :  { %v931_v43 = vadd.f32 %v927_v34, %v918_v38  ;;  %vm1057_vm1 = vcmp.eq.f32.partialorder %v1273_v11, 0.0  ;;  %p1275_p0 = scmp.ne.s32.totalorder %s1079_s23, %s1274_s1  ;;  %p1280_p2 = scmp.lt.s32.totalorder %s1274_s1, %s1274_s1 }
 0x56f   :  { %v944_v31 = vadd.f32 %v940_v45, %v931_v43  ;;  %p1281_p3 = por %p1280_p2, %p1279_p1 }
 0x570   :  { %877 = vrot.lane.b32.xlu0 %v848_v37, %s1315_s13  ;;  %814 = vperm.xlu1 %1255, %v1746_v25  }
 0x571   :  { %1256 = vset.pattern.permute.xlu0 %v1302_v19  ;;  %v786_v19 = vpop.permute.xlu0 %785  ;;  %p1282_p4 = pnand %p1281_p3, %p1275_p0 }
 0x572   :  { %v829_v48 = vmul.f32 %v820_v41, %v786_v19  ;;  %v1317_v41 = vmov 0.0  }
 0x573   :  { %v1111_v34 = vsel %vm1058_vm13, 1.0, %v1317_v41  ;;  %v1110_v38 = vsel %vm1057_vm1, 1.0, %v1317_v41 }
 0x574   :  { %v1063_v45 = vsub.f32 1.0, %v1110_v38 }
 0x596   :  { %v833_v50 = vpop.permute.xlu1 %832 }
 0x597   :  { %v847_v55 = vmul.f32 %v833_v50, %v1716_v3  ;;  %v925_v33 = vmul.f32 %v1104_v56, %v833_v50  ;;  %v1065_v50 = vmul.f32 %v1273_v11, %v1063_v45 }
 0x599   :  { %875 = vrot.lane.b32.xlu1 %v847_v55, %s1315_s13 }
 0x59b   :  { %v825_v18 = vpop.permute.xlu1 %824 }
 0x59c   :  { %v919_v23 = vmul.f32 %v1103_v51, %v825_v18 }
 0x59e   :  { %v932_v24 = vadd.f32 %v928_v9, %v919_v23 }
 0x5a0   :  { %v853_v26 = vpop.permute.xlu1 %852  ;;  %v945_v20 = vadd.f32 %v941_v49, %v932_v24 }
 0x5a1   :  { %v867_v62 = vmul.f32 %v853_v26, %v1748_v16  ;;  %v938_v15 = vmul.f32 %v1105_v44, %v853_v26 }
 0x5a3   :  { %891 = vrot.lane.b32.xlu1 %v867_v62, %s1316_s7 }
 0x5a4   :  { %v857_v21 = vpop.permute.xlu1 %856 }
 0x5a5   :  { %v868_v0 = vmul.f32 %v857_v21, %v1754_v63  ;;  %v926_v63 = vmul.f32 %v1104_v56, %v837_v10  ;;  %v939_v39 = vmul.f32 %v1105_v44, %v857_v21  ;;  %v1064_v44 = vsub.f32 1.0, %v1111_v34 }
 0x5a7   :  { %893 = vrot.lane.b32.xlu0 %v868_v0, %s1316_s7  ;;  %v1066_v43 = vmul.f32 %v1064_v44, %v1593_v7 }
 0x5a8   :  { %v788_v3 = vpop.permute.xlu1 %787 }
 0x5a9   :  { %v830_v61 = vmul.f32 %v825_v18, %v788_v3 }
 0x5ae   :  { %v882_v58 = vpop.permute.xlu1 %881 }
 0x5af   :  { %v906_v8 = vsel %vm53_vm0, %v830_v61, %v882_v58 }
 0x5d6   :  { %v880_v27 = vpop.permute.xlu0 %879 }
 0x5d7   :  { %v905_v4 = vsel %vm53_vm0, %v829_v48, %v880_v27 }
 0x5da   :  { %v896_v29 = vpop.permute.xlu0 %895 }
 0x5db   :  { %v909_v54 = vsel %vm407_vm14, %v905_v4, %v896_v29 }
 0x5dc   :  { %1179 = vmatprep.mubr.msk.f32.mxu1 %vm949_vm12, %v909_v54 }
 0x5de   :  { %v898_v14 = vpop.permute.xlu1 %897 }
 0x5df   :  { %v910_v57 = vsel %vm407_vm14, %v906_v8, %v898_v14 }
 0x5e0   :  { %1180 = vmatmul.mubr.msk.f32.vlgmr.msra.gmra.mrb[4].mxu1 %vm949_vm12, %v910_v57 }
 0x5eb   :  { %v810_v30 = vpop.permute.xlu0 %809 }
 0x5ec   :  { %v916_v35 = vmul.f32 %v1103_v51, %v810_v30  ;;  %v827_v2 = vmul.f32 %v810_v30, %v1712_v59 }
 0x5ee   :  { %v929_v25 = vadd.f32 %v925_v33, %v916_v35 }
 0x5ef   :  { %v815_v16 = vpop.permute.xlu1 %814  ;;  %v878_v22 = vpop.permute.xlu0 %877 }
 0x5f0   :  { %v917_v32 = vmul.f32 %v1103_v51, %v815_v16  ;;  %v942_v36 = vadd.f32 %v938_v15, %v929_v25  ;;  %v828_v53 = vmul.f32 %v1710_v46, %v815_v16 }
 0x5f2   :  { %v930_v17 = vadd.f32 %v926_v63, %v917_v32  ;;  %v904_v1 = vsel %vm53_vm0, %v828_v53, %v878_v22 }
 0x5f4   :  { %v943_v47 = vadd.f32 %v939_v39, %v930_v17 }
 0x60b   :  { %v876_v12 = vpop.permute.xlu1 %875 }
 0x60c   :  { %v903_v52 = vsel %vm53_vm0, %v827_v2, %v876_v12 }
 0x615   :  { %v892_v28 = vpop.permute.xlu1 %891 }
 0x616   :  { %v907_v13 = vsel %vm407_vm14, %v903_v52, %v892_v28 }
 0x617   :  { %1176 = vmatprep.mubr.msk.f32.mxu0 %vm949_vm12, %v907_v13 }
 0x619   :  { %v894_v60 = vpop.permute.xlu0 %893 }
 0x61a   :  { %v908_v5 = vsel %vm407_vm14, %v904_v1, %v894_v60 }
 0x61b   :  { %1177 = vmatmul.mubr.msk.f32.vlgmr.msra.gmra.mrb[8].mxu0 %vm949_vm12, %v908_v5 }
 0x6b3   :  { %v1181_v10 = vpop.f32.mrb[4].mxu1 }
 0x6b4   :  { %v1044_v6 = vadd.f32 %v1181_v10, %v945_v20  ;;  %v1038_v59 = vpop.f32.mrb[5].mxu1 }
 0x6b5   :  { %v1039_v42 = vadd.f32 %v1038_v59, %v944_v31 }
 0x6b6   :  { %1051 = vrot.lane.b32.xlu0 %v1044_v6, %s1315_s13 }
 0x6b7   :  { %1049 = vrot.lane.b32.xlu1 %v1039_v42, %s1315_s13 }
 0x6ee   :  { %v1178_v46 = vpop.f32.mrb[8].mxu0 }
 0x6ef   :  { %v1034_v51 = vadd.f32 %v1178_v46, %v943_v47  ;;  %v1028_v40 = vpop.f32.mrb[9].mxu0 }
 0x6f0   :  { %v1029_v56 = vadd.f32 %v1028_v40, %v942_v36 }
 0x728   :  { %v1052_v37 = vpop.permute.xlu0 %1051 }
 0x729   :  { %v1056_v31 = vsel %vm53_vm0, %v1034_v51, %v1052_v37  ;;  %v1050_v55 = vpop.permute.xlu1 %1049 }
 0x72a   :  { %v1068_v18 = vmul.f32 %v1111_v34, %v1056_v31  ;;  %v1055_v9 = vsel %vm53_vm0, %v1029_v56, %v1050_v55 }
 0x72b   :  { %v1067_v23 = vmul.f32 %v1110_v38, %v1055_v9 }
 0x72c   :  { %v1070_v49 = vadd.f32 %v1068_v18, %v1066_v43 }
 0x72d   :  { %v1069_v24 = vadd.f32 %v1067_v23, %v1065_v50 }
 0x72e   :  { %1072 = vst.msk [vmem:[#allocation2 + $0x8] sm:$0xff] %vm407_vm14, %v1070_v49 }
 0x72f   :  { %1071 = vst.msk [vmem:[#allocation2] sm:$0xff] %vm407_vm14, %v1069_v24 }
 0x730   :  { %1285 = shalt.err (!%p1282_p4)
}
 0x731   :  { %s1286_s26 = scalar_lea.hbm %s1848_s11, 256 }
 0x732   :  { %p1287_p5 = scmp.ne.s32.totalorder %s1848_s11, %s1286_s26  ;;  %p1290_p6 = scmp.lt.u32.totalorder %s1286_s26, %s1848_s11 }
 0x734   :  { %p1292_p7 = pnand %p1290_p6, %p1287_p5 }
 0x736   :  { %1295 = shalt.err (!%p1292_p7)
}
 0x737   :  { %s1319_s29 = smov 128  }
 0x738   :  { %1084 = dma.vmem_to_hbm [thread:$0]  %s1079_s23, 256, %s1848_s11, [#allocation3], %s1319_s29, %s1319_s29, %s1315_s13  }
 0x739   :  { %1296 = dma.done.wait [#allocation3], 256  }
 0x73a   :  { %1297 = vsyncadd [#allocation3], 4294967040 }
 0x73b   :  { %1088 = vsyncpa [#allocation3], 1 }

</bundles_post_ra>
